<compile_context>
chip_gen: v6e
topology: v6e:2x2x1
jax: 0.10.0
libtpu: 0.0.40
codegen_flags: <defaults>
</compile_context>

<pallas_src>
import math
import functools

import jax
import jax.numpy as jnp
from jax.experimental import pallas as pl
from jax.experimental.pallas import tpu as pltpu  # noqa: F401  (no-grid, whole-array VMEM kernel)


# ------------------------- the Pallas kernel -------------------------

def decoder_layer_kernel(n_head,
                         target_ref, enc_ref, pmask_ref,
                         w_self_ref, w_xq_ref, w_xkv_ref, w_fc_ref, w_pr_ref, b_ref,
                         out_ref):
    B, T, C = target_ref.shape
    Te = enc_ref.shape[1]
    H = n_head
    hd = C // H
    neg_inf = jnp.float32(-jnp.inf)

    # Activations as 2-D token slabs (rows = B*T); these reshapes are layout-trivial.
    tgt = target_ref[...].reshape(B * T, C)
    enc = enc_ref[...].reshape(B * Te, C)

    def layer_norm(x, i):
        # gains/biases live in rows (2i, 2i+1) of the packed bias slab; eps matches F.layer_norm.
        g = b_ref[2 * i:2 * i + 1, 0:C]
        b = b_ref[2 * i + 1:2 * i + 2, 0:C]
        mu = jnp.mean(x, axis=-1, keepdims=True)
        xc = x - mu
        var = jnp.mean(xc * xc, axis=-1, keepdims=True)
        return xc * jax.lax.rsqrt(var + 1e-5) * g + b

    def stack_heads(x2, n, w):
        # (B*n, H*w) -> (H*B, n, w): per-head static lane slices stacked along the leading axis.
        return jnp.concatenate(
            [x2[:, h * w:(h + 1) * w].reshape(B, n, w) for h in range(H)], axis=0)

    def attention(qs, ks, vs, bias, n_q):
        # qs: (H*B, n_q, hd); ks: (H*B, n_k, hd); vs: (H*B, n_k, C) (values already Wo-projected).
        # bias: additive mask (0 keep / -inf), broadcastable to (H*B, n_q, n_k).
        att = jnp.einsum("btd,bsd->bts", qs, ks,
                         preferred_element_type=jnp.float32) + bias
        m = jnp.max(att, axis=-1, keepdims=True)            # ONE softmax for all heads
        e = jnp.exp(att - m)
        s = jnp.sum(e, axis=-1, keepdims=True)
        p = e * pl.reciprocal(s, approx=True)                # EUP reciprocal, off the VPU path
        y = jnp.einsum("bts,bsc->btc", p, vs,
                       preferred_element_type=jnp.float32)   # (H*B, n_q, C)
        acc = y[0:B]                                         # head sum (output proj already folded)
        for h in range(1, H):
            acc = acc + y[h * B:(h + 1) * B]
        return acc.reshape(B * n_q, C)

    # Mask biases — computed once, no (T,T) mask DMA from HBM.
    row_i = jax.lax.broadcasted_iota(jnp.int32, (T, T), 0)
    col_i = jax.lax.broadcasted_iota(jnp.int32, (T, T), 1)
    causal_bias = jnp.where(row_i >= col_i, jnp.float32(0.0), neg_inf)                       # (T, T)
    pad_b = jnp.where(pmask_ref[...] == 0.0, neg_inf, jnp.float32(0.0))[:, None, :]          # (B,1,Te)
    pad_bias = jnp.concatenate([pad_b] * H, axis=0)                                          # (H*B,1,Te)

    # ---------------- self attention: target = ln_1(target); q = t_attn(target, ...) ----------
    t = layer_norm(tgt, 0)
    proj = jnp.dot(t, w_self_ref[...], preferred_element_type=jnp.float32)     # (B*T, 6C): q'|k|vo
    qs = stack_heads(proj[:, 0:C] + b_ref[6:7, 0:C], T, hd)          # q bias pre-scaled
    ks = stack_heads(proj[:, C:2 * C] + b_ref[6:7, C:2 * C], T, hd)
    vs = stack_heads(proj[:, 2 * C:6 * C], T, C)                     # per-head Wo-projected values
    sa = attention(qs, ks, vs, causal_bias, T) + b_ref[7:8, 0:C]     # + (t_bo + t_bv @ t_wo.T)

    # q = dropout(ln_2(q + target))   -- torch code rebinds `target` to ln_1(target) first
    q2 = layer_norm(sa + t, 1)

    # ---------------- cross attention: out = q + cross_attn(q, enc, enc, padding_mask) ---------
    xq = jnp.dot(q2, w_xq_ref[...], preferred_element_type=jnp.float32) + b_ref[8:9, 0:C]
    kv = jnp.dot(enc, w_xkv_ref[...], preferred_element_type=jnp.float32)     # (B*Te, 5C): k|vo
    qs = stack_heads(xq, T, hd)
    ks = stack_heads(kv[:, 0:C] + b_ref[9:10, 0:C], Te, hd)
    vs = stack_heads(kv[:, C:5 * C], Te, C)
    out = q2 + attention(qs, ks, vs, pad_bias, T) + b_ref[10:11, 0:C]

    # ---------------- MLP: return out + mlp(ln_3(out)) ------------------------------------------
    h1 = layer_norm(out, 2)
    h1 = jnp.dot(h1, w_fc_ref[...], preferred_element_type=jnp.float32) + b_ref[11:12, 0:4 * C]
    h1 = jnp.maximum(h1, 0.0)                                        # nn.ReLU
    h1 = jnp.dot(h1, w_pr_ref[...], preferred_element_type=jnp.float32) + b_ref[12:13, 0:C]
    out_ref[...] = (out + h1).reshape(B, T, C)


# ------------------------- wrapper -------------------------

def decoder_layer(enc, target, causal_mask, padding_mask, params, n_head):
    # `causal_mask` is accepted for API parity; the kernel generates the standard lower-triangular
    # causal mask in-kernel (iota) instead of DMAing a (T, T) array.
    del causal_mask
    B, T, C = target.shape
    H = n_head
    hd = C // H
    scale = 1.0 / math.sqrt(hd)

    def vo_fold(wv, wo):
        # Fold the per-head output projection into the value projection:
        #   Wvo_h = (wv.T)[:, h*hd:(h+1)*hd] @ (wo.T)[h*hd:(h+1)*hd, :]   -> (C, C) per head
        wvT, woT = wv.T, wo.T
        return jnp.concatenate(
            [wvT[:, h * hd:(h + 1) * hd] @ woT[h * hd:(h + 1) * hd, :] for h in range(H)], axis=1)

    # Pre-transposed, fused weight operands: every in-kernel dot is plain (M,K)x(K,N).
    w_self = jnp.concatenate([params["t_wq"].T * scale,                 # (C, C)  scale folded into Q
                              params["t_wk"].T,                         # (C, C)
                              vo_fold(params["t_wv"], params["t_wo"])], # (C, H*C)
                             axis=1)                                    # (C, 6C)
    w_xq = params["x_wq"].T * scale                                     # (C, C)
    w_xkv = jnp.concatenate([params["x_wk"].T,
                             vo_fold(params["x_wv"], params["x_wo"])], axis=1)   # (C, 5C)
    w_fc = params["fc_w"].T                                             # (C, 4C)
    w_pr = params["pr_w"].T                                             # (4C, C)

    # One lane-dense bias slab: 13 rows x 4C(=128) lanes, one DMA.
    W = 4 * C

    def row(v):
        v = jnp.reshape(v, (1, -1)).astype(jnp.float32)
        return jnp.pad(v, ((0, 0), (0, W - v.shape[1])))

    t_out_b = params["t_bo"].reshape(1, C) + params["t_bv"].reshape(1, C) @ params["t_wo"].T
    x_out_b = params["x_bo"].reshape(1, C) + params["x_bv"].reshape(1, C) @ params["x_wo"].T
    b_slab = jnp.concatenate([
        row(params["ln1_g"]), row(params["ln1_b"]),                             # rows 0-1
        row(params["ln2_g"]), row(params["ln2_b"]),                             # rows 2-3
        row(params["ln3_g"]), row(params["ln3_b"]),                             # rows 4-5
        row(jnp.concatenate([params["t_bq"].reshape(1, C) * scale,
                             params["t_bk"].reshape(1, C)], axis=1)),           # row 6: [bq'|bk]
        row(t_out_b),                                                           # row 7
        row(params["x_bq"].reshape(1, C) * scale),                              # row 8
        row(params["x_bk"]),                                                    # row 9
        row(x_out_b),                                                           # row 10
        row(params["fc_b"]),                                                    # row 11 (4C wide)
        row(params["pr_b"]),                                                    # row 12
    ], axis=0)                                                                  # (13, 4C)

    return pl.pallas_call(
        functools.partial(decoder_layer_kernel, n_head),
        out_shape=jax.ShapeDtypeStruct((B, T, C), jnp.float32),
        # No grid / default whole-array BlockSpecs: a single invocation with everything in VMEM.
    )(target, enc, padding_mask, w_self, w_xq, w_xkv, w_fc, w_pr, b_slab)


# ------------------------- pure-JAX reference -------------------------

def _ref_ln(x, g, b):
    mu = jnp.mean(x, axis=-1, keepdims=True)
    var = jnp.mean((x - mu) ** 2, axis=-1, keepdims=True)
    return (x - mu) * jax.lax.rsqrt(var + 1e-5) * g + b


def _ref_lin(x, w, b):
    return x @ w.T + b


def _ref_mha(qi, ki, vi, wq, bq, wk, bk, wv, bv, wo, bo, mask, n_head):
    B, T, C = qi.shape
    Tk = ki.shape[1]
    hd = C // n_head
    q = _ref_lin(qi, wq, bq).reshape(B, T, n_head, hd).transpose(0, 2, 1, 3)
    k = _ref_lin(ki, wk, bk).reshape(B, Tk, n_head, hd).transpose(0, 2, 1, 3)
    v = _ref_lin(vi, wv, bv).reshape(B, Tk, n_head, hd).transpose(0, 2, 1, 3)
    att = (q @ k.transpose(0, 1, 3, 2)) / math.sqrt(hd)
    att = jnp.where(mask == 0, -jnp.inf, att)
    att = jax.nn.softmax(att, axis=-1)
    y = (att @ v).transpose(0, 2, 1, 3).reshape(B, T, C)
    return _ref_lin(y, wo, bo)


def ref_decoder_layer(enc, target, cmask, pmask, p, n_head):
    t = _ref_ln(target, p["ln1_g"], p["ln1_b"])
    q = _ref_mha(t, t, t, p["t_wq"], p["t_bq"], p["t_wk"], p["t_bk"],
                 p["t_wv"], p["t_bv"], p["t_wo"], p["t_bo"],
                 cmask[None, None], n_head)
    q = _ref_ln(q + t, p["ln2_g"], p["ln2_b"])
    out = q + _ref_mha(q, enc, enc, p["x_wq"], p["x_bq"], p["x_wk"], p["x_bk"],
                       p["x_wv"], p["x_bv"], p["x_wo"], p["x_bo"],
                       pmask[:, None, None, :], n_head)
    h = _ref_ln(out, p["ln3_g"], p["ln3_b"])
    h = jnp.maximum(_ref_lin(h, p["fc_w"], p["fc_b"]), 0.0)
    return out + _ref_lin(h, p["pr_w"], p["pr_b"])


# ------------------------- main -------------------------

if __name__ == "__main__":
    # config: n_embd=32, n_head=4, bias=True, dropout=0.0, act_func="ReLU"
    B, T, Te, C, NH, DIL = 2, 8, 8, 32, 4, 4

    key = jax.random.PRNGKey(0)
    ks = iter(jax.random.split(key, 64))

    def w(shape, scale=0.02):
        return (scale * jax.random.normal(next(ks), shape)).astype(jnp.float32)

    params = {}
    for pre in ("t_", "x_"):
        params[pre + "wq"] = w((C, C)); params[pre + "bq"] = w((1, C))
        params[pre + "wk"] = w((C, C)); params[pre + "bk"] = w((1, C))
        params[pre + "wv"] = w((C, C)); params[pre + "bv"] = w((1, C))
        params[pre + "wo"] = w((C, C)); params[pre + "bo"] = w((1, C))
    for i in (1, 2, 3):
        params[f"ln{i}_g"] = jnp.ones((1, C), jnp.float32)
        params[f"ln{i}_b"] = jnp.zeros((1, C), jnp.float32)
    params["fc_w"] = w((DIL * C, C)); params["fc_b"] = w((1, DIL * C))
    params["pr_w"] = w((C, DIL * C)); params["pr_b"] = w((1, C))

    enc = jax.random.normal(next(ks), (B, Te, C), jnp.float32)
    target = jax.random.normal(next(ks), (B, T, C), jnp.float32)
    causal_mask = jnp.tril(jnp.ones((T, T), jnp.float32))          # 1 keep, 0 mask
    padding_mask = jnp.ones((B, Te), jnp.float32).at[1, Te - 2:].set(0.0)

    out = decoder_layer(enc, target, causal_mask, padding_mask, params, NH)
    out = jax.block_until_ready(out)

    ref = ref_decoder_layer(enc, target, causal_mask, padding_mask, params, NH)
    assert out.shape == (B, T, C)
    assert bool(jnp.all(jnp.isfinite(out))), "non-finite values in kernel output"
    assert jnp.allclose(out, ref, atol=5e-4, rtol=5e-4), "mismatch vs reference"

    print("KERNEL_OK")
</pallas_src>

<mosaic_0001>
module attributes {stable_mosaic.version = 11 : i64} {
  func.func @decoder_layer_kernel(%arg0: memref<2x8x32xf32, #tpu.memory_space<vmem>>, %arg1: memref<2x8x32xf32, #tpu.memory_space<vmem>>, %arg2: memref<2x8xf32, #tpu.memory_space<vmem>>, %arg3: memref<32x192xf32, #tpu.memory_space<vmem>>, %arg4: memref<32x32xf32, #tpu.memory_space<vmem>>, %arg5: memref<32x160xf32, #tpu.memory_space<vmem>>, %arg6: memref<32x128xf32, #tpu.memory_space<vmem>>, %arg7: memref<128x32xf32, #tpu.memory_space<vmem>>, %arg8: memref<13x128xf32, #tpu.memory_space<vmem>>, %arg9: memref<2x8x32xf32, #tpu.memory_space<vmem>>) attributes {dimension_semantics = [], scalar_prefetch = 0 : i64, scratch_operands = 0 : i64, tpu.core_type = #tpu.core_type<tc>} {
    %c0 = arith.constant 0 : index
    %c0_0 = arith.constant 0 : index
    %c0_1 = arith.constant 0 : index
    %0 = vector.load %arg0[%c0, %c0_0, %c0_1] : memref<2x8x32xf32, #tpu.memory_space<vmem>>, vector<2x8x32xf32>
    %1 = vector.shape_cast %0 : vector<2x8x32xf32> to vector<16x32xf32>
    %c0_2 = arith.constant 0 : index
    %c0_3 = arith.constant 0 : index
    %c0_4 = arith.constant 0 : index
    %2 = vector.load %arg1[%c0_2, %c0_3, %c0_4] : memref<2x8x32xf32, #tpu.memory_space<vmem>>, vector<2x8x32xf32>
    %3 = vector.shape_cast %2 : vector<2x8x32xf32> to vector<16x32xf32>
    %4 = tpu.iota {dimensions = array<i32: 0>} : vector<8x8xi32>
    %5 = tpu.iota {dimensions = array<i32: 1>} : vector<8x8xi32>
    %6 = arith.cmpi sge, %4, %5 : vector<8x8xi32>
    %cst = arith.constant 0.000000e+00 : f32
    %cst_5 = arith.constant 0xFF800000 : f32
    %7 = vector.broadcast %cst : f32 to vector<8x8xf32>
    %8 = vector.broadcast %cst_5 : f32 to vector<8x8xf32>
    %9 = arith.select %6, %7, %8 : vector<8x8xi1>, vector<8x8xf32>
    %c0_6 = arith.constant 0 : index
    %c0_7 = arith.constant 0 : index
    %10 = vector.load %arg2[%c0_6, %c0_7] : memref<2x8xf32, #tpu.memory_space<vmem>>, vector<2x8xf32>
    %cst_8 = arith.constant 0.000000e+00 : f32
    %11 = vector.broadcast %cst_8 : f32 to vector<2x8xf32>
    %12 = arith.cmpf oeq, %10, %11 : vector<2x8xf32>
    %cst_9 = arith.constant 0xFF800000 : f32
    %cst_10 = arith.constant 0.000000e+00 : f32
    %13 = vector.broadcast %cst_9 : f32 to vector<2x8xf32>
    %14 = vector.broadcast %cst_10 : f32 to vector<2x8xf32>
    %15 = arith.select %12, %13, %14 : vector<2x8xi1>, vector<2x8xf32>
    %16 = vector.shape_cast %15 : vector<2x8xf32> to vector<2x1x8xf32>
    %17 = tpu.concatenate %16, %16, %16, %16 in 0 : vector<2x1x8xf32>, vector<2x1x8xf32>, vector<2x1x8xf32>, vector<2x1x8xf32> -> vector<8x1x8xf32>
    %c0_11 = arith.constant 0 : index
    %c0_12 = arith.constant 0 : index
    %18 = vector.load %arg8[%c0_11, %c0_12] : memref<13x128xf32, #tpu.memory_space<vmem>>, vector<1x32xf32>
    %c1 = arith.constant 1 : index
    %c0_13 = arith.constant 0 : index
    %19 = vector.load %arg8[%c1, %c0_13] : memref<13x128xf32, #tpu.memory_space<vmem>>, vector<1x32xf32>
    %cst_14 = arith.constant dense<0.000000e+00> : vector<16xf32>
    %20 = vector.multi_reduction <add>, %1, %cst_14 [1] : vector<16x32xf32> to vector<16xf32>
    %21 = vector.shape_cast %20 : vector<16xf32> to vector<16x1xf32>
    %cst_15 = arith.constant 3.200000e+01 : f32
    %22 = vector.broadcast %cst_15 : f32 to vector<16x1xf32>
    %23 = arith.divf %21, %22 : vector<16x1xf32>
    %24 = vector.broadcast %23 : vector<16x1xf32> to vector<16x32xf32>
    %25 = arith.subf %1, %24 : vector<16x32xf32>
    %26 = arith.mulf %25, %25 : vector<16x32xf32>
    %cst_16 = arith.constant dense<0.000000e+00> : vector<16xf32>
    %27 = vector.multi_reduction <add>, %26, %cst_16 [1] : vector<16x32xf32> to vector<16xf32>
    %28 = vector.shape_cast %27 : vector<16xf32> to vector<16x1xf32>
    %cst_17 = arith.constant 3.200000e+01 : f32
    %29 = vector.broadcast %cst_17 : f32 to vector<16x1xf32>
    %30 = arith.divf %28, %29 : vector<16x1xf32>
    %cst_18 = arith.constant 9.99999974E-6 : f32
    %31 = vector.broadcast %cst_18 : f32 to vector<16x1xf32>
    %32 = arith.addf %30, %31 : vector<16x1xf32>
    %33 = math.rsqrt %32 : vector<16x1xf32>
    %34 = vector.broadcast %33 : vector<16x1xf32> to vector<16x32xf32>
    %35 = arith.mulf %25, %34 : vector<16x32xf32>
    %36 = vector.broadcast %18 : vector<1x32xf32> to vector<16x32xf32>
    %37 = arith.mulf %35, %36 : vector<16x32xf32>
    %38 = vector.broadcast %19 : vector<1x32xf32> to vector<16x32xf32>
    %39 = arith.addf %37, %38 : vector<16x32xf32>
    %c0_19 = arith.constant 0 : index
    %c0_20 = arith.constant 0 : index
    %40 = vector.load %arg3[%c0_19, %c0_20] : memref<32x192xf32, #tpu.memory_space<vmem>>, vector<32x192xf32>
    %cst_21 = arith.constant dense<0.000000e+00> : vector<16x192xf32>
    %41 = tpu.matmul %39, %40, %cst_21 {dimension_numbers = #tpu.dot_dimension_numbers<[1], [0], [0], [1], [0, 0, 1, 1], [], []>} : vector<16x32xf32>, vector<32x192xf32>, vector<16x192xf32> -> vector<16x192xf32>
    %42 = vector.extract_strided_slice %41 {offsets = [0, 0], sizes = [16, 32], strides = [1, 1]} : vector<16x192xf32> to vector<16x32xf32>
    %c6 = arith.constant 6 : index
    %c0_22 = arith.constant 0 : index
    %43 = vector.load %arg8[%c6, %c0_22] : memref<13x128xf32, #tpu.memory_space<vmem>>, vector<1x32xf32>
    %44 = vector.broadcast %43 : vector<1x32xf32> to vector<16x32xf32>
    %45 = arith.addf %42, %44 : vector<16x32xf32>
    %46 = vector.extract_strided_slice %45 {offsets = [0, 0], sizes = [16, 8], strides = [1, 1]} : vector<16x32xf32> to vector<16x8xf32>
    %47 = vector.shape_cast %46 : vector<16x8xf32> to vector<2x8x8xf32>
    %48 = vector.extract_strided_slice %45 {offsets = [0, 8], sizes = [16, 8], strides = [1, 1]} : vector<16x32xf32> to vector<16x8xf32>
    %49 = vector.shape_cast %48 : vector<16x8xf32> to vector<2x8x8xf32>
    %50 = vector.extract_strided_slice %45 {offsets = [0, 16], sizes = [16, 8], strides = [1, 1]} : vector<16x32xf32> to vector<16x8xf32>
    %51 = vector.shape_cast %50 : vector<16x8xf32> to vector<2x8x8xf32>
    %52 = vector.extract_strided_slice %45 {offsets = [0, 24], sizes = [16, 8], strides = [1, 1]} : vector<16x32xf32> to vector<16x8xf32>
    %53 = vector.shape_cast %52 : vector<16x8xf32> to vector<2x8x8xf32>
    %54 = tpu.concatenate %47, %49, %51, %53 in 0 : vector<2x8x8xf32>, vector<2x8x8xf32>, vector<2x8x8xf32>, vector<2x8x8xf32> -> vector<8x8x8xf32>
    %55 = vector.extract_strided_slice %41 {offsets = [0, 32], sizes = [16, 32], strides = [1, 1]} : vector<16x192xf32> to vector<16x32xf32>
    %c6_23 = arith.constant 6 : index
    %c32 = arith.constant 32 : index
    %56 = vector.load %arg8[%c6_23, %c32] : memref<13x128xf32, #tpu.memory_space<vmem>>, vector<1x32xf32>
    %57 = vector.broadcast %56 : vector<1x32xf32> to vector<16x32xf32>
    %58 = arith.addf %55, %57 : vector<16x32xf32>
    %59 = vector.extract_strided_slice %58 {offsets = [0, 0], sizes = [16, 8], strides = [1, 1]} : vector<16x32xf32> to vector<16x8xf32>
    %60 = vector.shape_cast %59 : vector<16x8xf32> to vector<2x8x8xf32>
    %61 = vector.extract_strided_slice %58 {offsets = [0, 8], sizes = [16, 8], strides = [1, 1]} : vector<16x32xf32> to vector<16x8xf32>
    %62 = vector.shape_cast %61 : vector<16x8xf32> to vector<2x8x8xf32>
    %63 = vector.extract_strided_slice %58 {offsets = [0, 16], sizes = [16, 8], strides = [1, 1]} : vector<16x32xf32> to vector<16x8xf32>
    %64 = vector.shape_cast %63 : vector<16x8xf32> to vector<2x8x8xf32>
    %65 = vector.extract_strided_slice %58 {offsets = [0, 24], sizes = [16, 8], strides = [1, 1]} : vector<16x32xf32> to vector<16x8xf32>
    %66 = vector.shape_cast %65 : vector<16x8xf32> to vector<2x8x8xf32>
    %67 = tpu.concatenate %60, %62, %64, %66 in 0 : vector<2x8x8xf32>, vector<2x8x8xf32>, vector<2x8x8xf32>, vector<2x8x8xf32> -> vector<8x8x8xf32>
    %68 = vector.extract_strided_slice %41 {offsets = [0, 64], sizes = [16, 128], strides = [1, 1]} : vector<16x192xf32> to vector<16x128xf32>
    %69 = vector.extract_strided_slice %68 {offsets = [0, 0], sizes = [16, 32], strides = [1, 1]} : vector<16x128xf32> to vector<16x32xf32>
    %70 = vector.shape_cast %69 : vector<16x32xf32> to vector<2x8x32xf32>
    %71 = vector.extract_strided_slice %68 {offsets = [0, 32], sizes = [16, 32], strides = [1, 1]} : vector<16x128xf32> to vector<16x32xf32>
    %72 = vector.shape_cast %71 : vector<16x32xf32> to vector<2x8x32xf32>
    %73 = vector.extract_strided_slice %68 {offsets = [0, 64], sizes = [16, 32], strides = [1, 1]} : vector<16x128xf32> to vector<16x32xf32>
    %74 = vector.shape_cast %73 : vector<16x32xf32> to vector<2x8x32xf32>
    %75 = vector.extract_strided_slice %68 {offsets = [0, 96], sizes = [16, 32], strides = [1, 1]} : vector<16x128xf32> to vector<16x32xf32>
    %76 = vector.shape_cast %75 : vector<16x32xf32> to vector<2x8x32xf32>
    %77 = tpu.concatenate %70, %72, %74, %76 in 0 : vector<2x8x32xf32>, vector<2x8x32xf32>, vector<2x8x32xf32>, vector<2x8x32xf32> -> vector<8x8x32xf32>
    "tpu.trace_start"() <{level = 10 : i32, message = "btd,bsd->bts"}> : () -> ()
    %cst_24 = arith.constant dense<0.000000e+00> : vector<8x8x8xf32>
    %78 = tpu.matmul %54, %67, %cst_24 {dimension_numbers = #tpu.dot_dimension_numbers<[2], [2], [1], [1], [0, 0, 0, 1, 1, 1], [0], [0]>} : vector<8x8x8xf32>, vector<8x8x8xf32>, vector<8x8x8xf32> -> vector<8x8x8xf32>
    "tpu.trace_stop"() : () -> ()
    %79 = vector.shape_cast %9 : vector<8x8xf32> to vector<1x8x8xf32>
    %80 = vector.broadcast %79 : vector<1x8x8xf32> to vector<8x8x8xf32>
    %81 = arith.addf %78, %80 : vector<8x8x8xf32>
    %cst_25 = arith.constant dense<0xFF800000> : vector<8x8xf32>
    %82 = vector.multi_reduction <maximumf>, %81, %cst_25 [2] : vector<8x8x8xf32> to vector<8x8xf32>
    %83 = vector.shape_cast %82 : vector<8x8xf32> to vector<8x8x1xf32>
    %84 = vector.broadcast %83 : vector<8x8x1xf32> to vector<8x8x8xf32>
    %85 = arith.subf %81, %84 : vector<8x8x8xf32>
    %86 = math.exp %85 : vector<8x8x8xf32>
    %cst_26 = arith.constant dense<0.000000e+00> : vector<8x8xf32>
    %87 = vector.multi_reduction <add>, %86, %cst_26 [2] : vector<8x8x8xf32> to vector<8x8xf32>
    %88 = vector.shape_cast %87 : vector<8x8xf32> to vector<8x8x1xf32>
    %89 = tpu.reciprocal %88 {approx = true} : vector<8x8x1xf32> -> vector<8x8x1xf32>
    %90 = vector.broadcast %89 : vector<8x8x1xf32> to vector<8x8x8xf32>
    %91 = arith.mulf %86, %90 : vector<8x8x8xf32>
    "tpu.trace_start"() <{level = 10 : i32, message = "bts,bsc->btc"}> : () -> ()
    %cst_27 = arith.constant dense<0.000000e+00> : vector<8x8x32xf32>
    %92 = tpu.matmul %91, %77, %cst_27 {dimension_numbers = #tpu.dot_dimension_numbers<[2], [1], [1], [2], [0, 0, 0, 1, 1, 2], [0], [0]>} : vector<8x8x8xf32>, vector<8x8x32xf32>, vector<8x8x32xf32> -> vector<8x8x32xf32>
    "tpu.trace_stop"() : () -> ()
    %93 = vector.extract_strided_slice %92 {offsets = [0, 0, 0], sizes = [2, 8, 32], strides = [1, 1, 1]} : vector<8x8x32xf32> to vector<2x8x32xf32>
    %94 = vector.extract_strided_slice %92 {offsets = [2, 0, 0], sizes = [2, 8, 32], strides = [1, 1, 1]} : vector<8x8x32xf32> to vector<2x8x32xf32>
    %95 = arith.addf %93, %94 : vector<2x8x32xf32>
    %96 = vector.extract_strided_slice %92 {offsets = [4, 0, 0], sizes = [2, 8, 32], strides = [1, 1, 1]} : vector<8x8x32xf32> to vector<2x8x32xf32>
    %97 = arith.addf %95, %96 : vector<2x8x32xf32>
    %98 = vector.extract_strided_slice %92 {offsets = [6, 0, 0], sizes = [2, 8, 32], strides = [1, 1, 1]} : vector<8x8x32xf32> to vector<2x8x32xf32>
    %99 = arith.addf %97, %98 : vector<2x8x32xf32>
    %100 = vector.shape_cast %99 : vector<2x8x32xf32> to vector<16x32xf32>
    %c7 = arith.constant 7 : index
    %c0_28 = arith.constant 0 : index
    %101 = vector.load %arg8[%c7, %c0_28] : memref<13x128xf32, #tpu.memory_space<vmem>>, vector<1x32xf32>
    %102 = vector.broadcast %101 : vector<1x32xf32> to vector<16x32xf32>
    %103 = arith.addf %100, %102 : vector<16x32xf32>
    %104 = arith.addf %103, %39 : vector<16x32xf32>
    %c2 = arith.constant 2 : index
    %c0_29 = arith.constant 0 : index
    %105 = vector.load %arg8[%c2, %c0_29] : memref<13x128xf32, #tpu.memory_space<vmem>>, vector<1x32xf32>
    %c3 = arith.constant 3 : index
    %c0_30 = arith.constant 0 : index
    %106 = vector.load %arg8[%c3, %c0_30] : memref<13x128xf32, #tpu.memory_space<vmem>>, vector<1x32xf32>
    %cst_31 = arith.constant dense<0.000000e+00> : vector<16xf32>
    %107 = vector.multi_reduction <add>, %104, %cst_31 [1] : vector<16x32xf32> to vector<16xf32>
    %108 = vector.shape_cast %107 : vector<16xf32> to vector<16x1xf32>
    %cst_32 = arith.constant 3.200000e+01 : f32
    %109 = vector.broadcast %cst_32 : f32 to vector<16x1xf32>
    %110 = arith.divf %108, %109 : vector<16x1xf32>
    %111 = vector.broadcast %110 : vector<16x1xf32> to vector<16x32xf32>
    %112 = arith.subf %104, %111 : vector<16x32xf32>
    %113 = arith.mulf %112, %112 : vector<16x32xf32>
    %cst_33 = arith.constant dense<0.000000e+00> : vector<16xf32>
    %114 = vector.multi_reduction <add>, %113, %cst_33 [1] : vector<16x32xf32> to vector<16xf32>
    %115 = vector.shape_cast %114 : vector<16xf32> to vector<16x1xf32>
    %cst_34 = arith.constant 3.200000e+01 : f32
    %116 = vector.broadcast %cst_34 : f32 to vector<16x1xf32>
    %117 = arith.divf %115, %116 : vector<16x1xf32>
    %cst_35 = arith.constant 9.99999974E-6 : f32
    %118 = vector.broadcast %cst_35 : f32 to vector<16x1xf32>
    %119 = arith.addf %117, %118 : vector<16x1xf32>
    %120 = math.rsqrt %119 : vector<16x1xf32>
    %121 = vector.broadcast %120 : vector<16x1xf32> to vector<16x32xf32>
    %122 = arith.mulf %112, %121 : vector<16x32xf32>
    %123 = vector.broadcast %105 : vector<1x32xf32> to vector<16x32xf32>
    %124 = arith.mulf %122, %123 : vector<16x32xf32>
    %125 = vector.broadcast %106 : vector<1x32xf32> to vector<16x32xf32>
    %126 = arith.addf %124, %125 : vector<16x32xf32>
    %c0_36 = arith.constant 0 : index
    %c0_37 = arith.constant 0 : index
    %127 = vector.load %arg4[%c0_36, %c0_37] : memref<32x32xf32, #tpu.memory_space<vmem>>, vector<32x32xf32>
    %cst_38 = arith.constant dense<0.000000e+00> : vector<16x32xf32>
    %128 = tpu.matmul %126, %127, %cst_38 {dimension_numbers = #tpu.dot_dimension_numbers<[1], [0], [0], [1], [0, 0, 1, 1], [], []>} : vector<16x32xf32>, vector<32x32xf32>, vector<16x32xf32> -> vector<16x32xf32>
    %c8 = arith.constant 8 : index
    %c0_39 = arith.constant 0 : index
    %129 = vector.load %arg8[%c8, %c0_39] : memref<13x128xf32, #tpu.memory_space<vmem>>, vector<1x32xf32>
    %130 = vector.broadcast %129 : vector<1x32xf32> to vector<16x32xf32>
    %131 = arith.addf %128, %130 : vector<16x32xf32>
    %c0_40 = arith.constant 0 : index
    %c0_41 = arith.constant 0 : index
    %132 = vector.load %arg5[%c0_40, %c0_41] : memref<32x160xf32, #tpu.memory_space<vmem>>, vector<32x160xf32>
    %cst_42 = arith.constant dense<0.000000e+00> : vector<16x160xf32>
    %133 = tpu.matmul %3, %132, %cst_42 {dimension_numbers = #tpu.dot_dimension_numbers<[1], [0], [0], [1], [0, 0, 1, 1], [], []>} : vector<16x32xf32>, vector<32x160xf32>, vector<16x160xf32> -> vector<16x160xf32>
    %134 = vector.extract_strided_slice %131 {offsets = [0, 0], sizes = [16, 8], strides = [1, 1]} : vector<16x32xf32> to vector<16x8xf32>
    %135 = vector.shape_cast %134 : vector<16x8xf32> to vector<2x8x8xf32>
    %136 = vector.extract_strided_slice %131 {offsets = [0, 8], sizes = [16, 8], strides = [1, 1]} : vector<16x32xf32> to vector<16x8xf32>
    %137 = vector.shape_cast %136 : vector<16x8xf32> to vector<2x8x8xf32>
    %138 = vector.extract_strided_slice %131 {offsets = [0, 16], sizes = [16, 8], strides = [1, 1]} : vector<16x32xf32> to vector<16x8xf32>
    %139 = vector.shape_cast %138 : vector<16x8xf32> to vector<2x8x8xf32>
    %140 = vector.extract_strided_slice %131 {offsets = [0, 24], sizes = [16, 8], strides = [1, 1]} : vector<16x32xf32> to vector<16x8xf32>
    %141 = vector.shape_cast %140 : vector<16x8xf32> to vector<2x8x8xf32>
    %142 = tpu.concatenate %135, %137, %139, %141 in 0 : vector<2x8x8xf32>, vector<2x8x8xf32>, vector<2x8x8xf32>, vector<2x8x8xf32> -> vector<8x8x8xf32>
    %143 = vector.extract_strided_slice %133 {offsets = [0, 0], sizes = [16, 32], strides = [1, 1]} : vector<16x160xf32> to vector<16x32xf32>
    %c9 = arith.constant 9 : index
    %c0_43 = arith.constant 0 : index
    %144 = vector.load %arg8[%c9, %c0_43] : memref<13x128xf32, #tpu.memory_space<vmem>>, vector<1x32xf32>
    %145 = vector.broadcast %144 : vector<1x32xf32> to vector<16x32xf32>
    %146 = arith.addf %143, %145 : vector<16x32xf32>
    %147 = vector.extract_strided_slice %146 {offsets = [0, 0], sizes = [16, 8], strides = [1, 1]} : vector<16x32xf32> to vector<16x8xf32>
    %148 = vector.shape_cast %147 : vector<16x8xf32> to vector<2x8x8xf32>
    %149 = vector.extract_strided_slice %146 {offsets = [0, 8], sizes = [16, 8], strides = [1, 1]} : vector<16x32xf32> to vector<16x8xf32>
    %150 = vector.shape_cast %149 : vector<16x8xf32> to vector<2x8x8xf32>
    %151 = vector.extract_strided_slice %146 {offsets = [0, 16], sizes = [16, 8], strides = [1, 1]} : vector<16x32xf32> to vector<16x8xf32>
    %152 = vector.shape_cast %151 : vector<16x8xf32> to vector<2x8x8xf32>
    %153 = vector.extract_strided_slice %146 {offsets = [0, 24], sizes = [16, 8], strides = [1, 1]} : vector<16x32xf32> to vector<16x8xf32>
    %154 = vector.shape_cast %153 : vector<16x8xf32> to vector<2x8x8xf32>
    %155 = tpu.concatenate %148, %150, %152, %154 in 0 : vector<2x8x8xf32>, vector<2x8x8xf32>, vector<2x8x8xf32>, vector<2x8x8xf32> -> vector<8x8x8xf32>
    %156 = vector.extract_strided_slice %133 {offsets = [0, 32], sizes = [16, 128], strides = [1, 1]} : vector<16x160xf32> to vector<16x128xf32>
    %157 = vector.extract_strided_slice %156 {offsets = [0, 0], sizes = [16, 32], strides = [1, 1]} : vector<16x128xf32> to vector<16x32xf32>
    %158 = vector.shape_cast %157 : vector<16x32xf32> to vector<2x8x32xf32>
    %159 = vector.extract_strided_slice %156 {offsets = [0, 32], sizes = [16, 32], strides = [1, 1]} : vector<16x128xf32> to vector<16x32xf32>
    %160 = vector.shape_cast %159 : vector<16x32xf32> to vector<2x8x32xf32>
    %161 = vector.extract_strided_slice %156 {offsets = [0, 64], sizes = [16, 32], strides = [1, 1]} : vector<16x128xf32> to vector<16x32xf32>
    %162 = vector.shape_cast %161 : vector<16x32xf32> to vector<2x8x32xf32>
    %163 = vector.extract_strided_slice %156 {offsets = [0, 96], sizes = [16, 32], strides = [1, 1]} : vector<16x128xf32> to vector<16x32xf32>
    %164 = vector.shape_cast %163 : vector<16x32xf32> to vector<2x8x32xf32>
    %165 = tpu.concatenate %158, %160, %162, %164 in 0 : vector<2x8x32xf32>, vector<2x8x32xf32>, vector<2x8x32xf32>, vector<2x8x32xf32> -> vector<8x8x32xf32>
    "tpu.trace_start"() <{level = 10 : i32, message = "btd,bsd->bts"}> : () -> ()
    %cst_44 = arith.constant dense<0.000000e+00> : vector<8x8x8xf32>
    %166 = tpu.matmul %142, %155, %cst_44 {dimension_numbers = #tpu.dot_dimension_numbers<[2], [2], [1], [1], [0, 0, 0, 1, 1, 1], [0], [0]>} : vector<8x8x8xf32>, vector<8x8x8xf32>, vector<8x8x8xf32> -> vector<8x8x8xf32>
    "tpu.trace_stop"() : () -> ()
    %167 = vector.broadcast %17 : vector<8x1x8xf32> to vector<8x8x8xf32>
    %168 = arith.addf %166, %167 : vector<8x8x8xf32>
    %cst_45 = arith.constant dense<0xFF800000> : vector<8x8xf32>
    %169 = vector.multi_reduction <maximumf>, %168, %cst_45 [2] : vector<8x8x8xf32> to vector<8x8xf32>
    %170 = vector.shape_cast %169 : vector<8x8xf32> to vector<8x8x1xf32>
    %171 = vector.broadcast %170 : vector<8x8x1xf32> to vector<8x8x8xf32>
    %172 = arith.subf %168, %171 : vector<8x8x8xf32>
    %173 = math.exp %172 : vector<8x8x8xf32>
    %cst_46 = arith.constant dense<0.000000e+00> : vector<8x8xf32>
    %174 = vector.multi_reduction <add>, %173, %cst_46 [2] : vector<8x8x8xf32> to vector<8x8xf32>
    %175 = vector.shape_cast %174 : vector<8x8xf32> to vector<8x8x1xf32>
    %176 = tpu.reciprocal %175 {approx = true} : vector<8x8x1xf32> -> vector<8x8x1xf32>
    %177 = vector.broadcast %176 : vector<8x8x1xf32> to vector<8x8x8xf32>
    %178 = arith.mulf %173, %177 : vector<8x8x8xf32>
    "tpu.trace_start"() <{level = 10 : i32, message = "bts,bsc->btc"}> : () -> ()
    %cst_47 = arith.constant dense<0.000000e+00> : vector<8x8x32xf32>
    %179 = tpu.matmul %178, %165, %cst_47 {dimension_numbers = #tpu.dot_dimension_numbers<[2], [1], [1], [2], [0, 0, 0, 1, 1, 2], [0], [0]>} : vector<8x8x8xf32>, vector<8x8x32xf32>, vector<8x8x32xf32> -> vector<8x8x32xf32>
    "tpu.trace_stop"() : () -> ()
    %180 = vector.extract_strided_slice %179 {offsets = [0, 0, 0], sizes = [2, 8, 32], strides = [1, 1, 1]} : vector<8x8x32xf32> to vector<2x8x32xf32>
    %181 = vector.extract_strided_slice %179 {offsets = [2, 0, 0], sizes = [2, 8, 32], strides = [1, 1, 1]} : vector<8x8x32xf32> to vector<2x8x32xf32>
    %182 = arith.addf %180, %181 : vector<2x8x32xf32>
    %183 = vector.extract_strided_slice %179 {offsets = [4, 0, 0], sizes = [2, 8, 32], strides = [1, 1, 1]} : vector<8x8x32xf32> to vector<2x8x32xf32>
    %184 = arith.addf %182, %183 : vector<2x8x32xf32>
    %185 = vector.extract_strided_slice %179 {offsets = [6, 0, 0], sizes = [2, 8, 32], strides = [1, 1, 1]} : vector<8x8x32xf32> to vector<2x8x32xf32>
    %186 = arith.addf %184, %185 : vector<2x8x32xf32>
    %187 = vector.shape_cast %186 : vector<2x8x32xf32> to vector<16x32xf32>
    %188 = arith.addf %126, %187 : vector<16x32xf32>
    %c10 = arith.constant 10 : index
    %c0_48 = arith.constant 0 : index
    %189 = vector.load %arg8[%c10, %c0_48] : memref<13x128xf32, #tpu.memory_space<vmem>>, vector<1x32xf32>
    %190 = vector.broadcast %189 : vector<1x32xf32> to vector<16x32xf32>
    %191 = arith.addf %188, %190 : vector<16x32xf32>
    %c4 = arith.constant 4 : index
    %c0_49 = arith.constant 0 : index
    %192 = vector.load %arg8[%c4, %c0_49] : memref<13x128xf32, #tpu.memory_space<vmem>>, vector<1x32xf32>
    %c5 = arith.constant 5 : index
    %c0_50 = arith.constant 0 : index
    %193 = vector.load %arg8[%c5, %c0_50] : memref<13x128xf32, #tpu.memory_space<vmem>>, vector<1x32xf32>
    %cst_51 = arith.constant dense<0.000000e+00> : vector<16xf32>
    %194 = vector.multi_reduction <add>, %191, %cst_51 [1] : vector<16x32xf32> to vector<16xf32>
    %195 = vector.shape_cast %194 : vector<16xf32> to vector<16x1xf32>
    %cst_52 = arith.constant 3.200000e+01 : f32
    %196 = vector.broadcast %cst_52 : f32 to vector<16x1xf32>
    %197 = arith.divf %195, %196 : vector<16x1xf32>
    %198 = vector.broadcast %197 : vector<16x1xf32> to vector<16x32xf32>
    %199 = arith.subf %191, %198 : vector<16x32xf32>
    %200 = arith.mulf %199, %199 : vector<16x32xf32>
    %cst_53 = arith.constant dense<0.000000e+00> : vector<16xf32>
    %201 = vector.multi_reduction <add>, %200, %cst_53 [1] : vector<16x32xf32> to vector<16xf32>
    %202 = vector.shape_cast %201 : vector<16xf32> to vector<16x1xf32>
    %cst_54 = arith.constant 3.200000e+01 : f32
    %203 = vector.broadcast %cst_54 : f32 to vector<16x1xf32>
    %204 = arith.divf %202, %203 : vector<16x1xf32>
    %cst_55 = arith.constant 9.99999974E-6 : f32
    %205 = vector.broadcast %cst_55 : f32 to vector<16x1xf32>
    %206 = arith.addf %204, %205 : vector<16x1xf32>
    %207 = math.rsqrt %206 : vector<16x1xf32>
    %208 = vector.broadcast %207 : vector<16x1xf32> to vector<16x32xf32>
    %209 = arith.mulf %199, %208 : vector<16x32xf32>
    %210 = vector.broadcast %192 : vector<1x32xf32> to vector<16x32xf32>
    %211 = arith.mulf %209, %210 : vector<16x32xf32>
    %212 = vector.broadcast %193 : vector<1x32xf32> to vector<16x32xf32>
    %213 = arith.addf %211, %212 : vector<16x32xf32>
    %c0_56 = arith.constant 0 : index
    %c0_57 = arith.constant 0 : index
    %214 = vector.load %arg6[%c0_56, %c0_57] : memref<32x128xf32, #tpu.memory_space<vmem>>, vector<32x128xf32>
    %cst_58 = arith.constant dense<0.000000e+00> : vector<16x128xf32>
    %215 = tpu.matmul %213, %214, %cst_58 {dimension_numbers = #tpu.dot_dimension_numbers<[1], [0], [0], [1], [0, 0, 1, 1], [], []>} : vector<16x32xf32>, vector<32x128xf32>, vector<16x128xf32> -> vector<16x128xf32>
    %c11 = arith.constant 11 : index
    %c0_59 = arith.constant 0 : index
    %216 = vector.load %arg8[%c11, %c0_59] : memref<13x128xf32, #tpu.memory_space<vmem>>, vector<1x128xf32>
    %217 = vector.broadcast %216 : vector<1x128xf32> to vector<16x128xf32>
    %218 = arith.addf %215, %217 : vector<16x128xf32>
    %cst_60 = arith.constant 0.000000e+00 : f32
    %219 = vector.broadcast %cst_60 : f32 to vector<16x128xf32>
    %220 = arith.maximumf %218, %219 : vector<16x128xf32>
    %c0_61 = arith.constant 0 : index
    %c0_62 = arith.constant 0 : index
    %221 = vector.load %arg7[%c0_61, %c0_62] : memref<128x32xf32, #tpu.memory_space<vmem>>, vector<128x32xf32>
    %cst_63 = arith.constant dense<0.000000e+00> : vector<16x32xf32>
    %222 = tpu.matmul %220, %221, %cst_63 {dimension_numbers = #tpu.dot_dimension_numbers<[1], [0], [0], [1], [0, 0, 1, 1], [], []>} : vector<16x128xf32>, vector<128x32xf32>, vector<16x32xf32> -> vector<16x32xf32>
    %c12 = arith.constant 12 : index
    %c0_64 = arith.constant 0 : index
    %223 = vector.load %arg8[%c12, %c0_64] : memref<13x128xf32, #tpu.memory_space<vmem>>, vector<1x32xf32>
    %224 = vector.broadcast %223 : vector<1x32xf32> to vector<16x32xf32>
    %225 = arith.addf %222, %224 : vector<16x32xf32>
    %226 = arith.addf %191, %225 : vector<16x32xf32>
    %227 = vector.shape_cast %226 : vector<16x32xf32> to vector<2x8x32xf32>
    %c0_65 = arith.constant 0 : index
    %c0_66 = arith.constant 0 : index
    %c0_67 = arith.constant 0 : index
    %228 = vector.load %arg9[%c0_65, %c0_66, %c0_67] : memref<2x8x32xf32, #tpu.memory_space<vmem>>, vector<2x8x32xf32>
    tpu.vector_store %arg9[%c0_65, %c0_66, %c0_67], %227 {strides = array<i32>} : memref<2x8x32xf32, #tpu.memory_space<vmem>>, vector<2x8x32xf32>,
    return
  }
}

</mosaic_0001>

<bundles_post_ra>
// kernel: tpu_custom_call.1
= control target key start
LH: loop header
LB: loop body
LE: loop exit
PB: predicated region body
PF: predicated region fallthrough
CT: control target
= control target key end

     0   :  { %14 = vsyncpa [#allocation3], 0  ;;  %s4614_s0 = inlined_call_operand.hbm [shape: f32[2,8,32], index: 0, kind: input, shape index: {}]   ;;  %s4615_s1 = inlined_call_operand.hbm [shape: f32[2,8,32], index: 1, kind: input, shape index: {}]   ;;  %s4616_s2 = inlined_call_operand.vmem [shape: f32[2,8], index: 2, kind: input, shape index: {}]   ;;  %s4617_s3 = inlined_call_operand.vmem [shape: f32[32,192], index: 3, kind: input, shape index: {}]   ;;  %s4618_s4 = inlined_call_operand.vmem [shape: f32[32,32], index: 4, kind: input, shape index: {}]   ;;  %s4619_s5 = inlined_call_operand.vmem [shape: f32[32,160], index: 5, kind: input, shape index: {}]   ;;  %s4620_s6 = inlined_call_operand.hbm [shape: f32[32,128], index: 6, kind: input, shape index: {}]   ;;  %s4621_s7 = inlined_call_operand.vmem [shape: f32[128,32], index: 7, kind: input, shape index: {}]   ;;  %s4622_s8 = inlined_call_operand.hbm [shape: f32[13,128], index: 8, kind: input, shape index: {}]   ;;  %s4623_s9 = inlined_call_operand.hbm [shape: f32[2,8,32], index: 9, kind: output, shape index: {}]  }
   0x1   :  { %15 = vsyncpa [#allocation6], 0 }
   0x2   :  { %16 = vsyncpa [#allocation9], 0 }
   0x3   :  { %17 = vsyncpa [#allocation4], 0  ;;  %s4027_s30 = smov [#allocation5]   ;;  %s4028_s11 = smov [#allocation2]  }
   0x4   :  { %s35_s10 = sshll.u32 %s4027_s30, 4  ;;  %s23_s12 = sshll.u32 %s4028_s11, 4  ;;  %s36_s10 = int_to_ptr.vmem [resolvable:$true] %s35_s10  ;;  %s24_s12 = int_to_ptr.vmem [resolvable:$true] %s23_s12 }
   0x5   :  { %s3927_s13 = scalar_lea.vmem %s36_s10, 256  ;;  %p3932_p1 = scmp.lt.s32.totalorder %s36_s10, %s36_s10 }
   0x6   :  { %p3928_p0 = scmp.ne.s32.totalorder %s36_s10, %s3927_s13  ;;  %p3933_p2 = scmp.lt.s32.totalorder %s3927_s13, %s3927_s13 }
   0x8   :  { %p3934_p3 = por %p3933_p2, %p3932_p1 }
   0xa   :  { %p3935_p4 = pnand %p3934_p3, %p3928_p0 }
   0xc   :  { %3938 = shalt.err (!%p3935_p4)
}
   0xd   :  { %s4029_s14 = smov 128   ;;  %s4030_s15 = smov 8  }
   0xe   :  { %41 = dma.hbm_to_vmem [thread:$0]  %s4615_s1, 256, %s36_s10, [#allocation6], %s4029_s14, %s4029_s14, %s4030_s15  }
   0xf   :  { %s3947_s18 = scalar_lea.vmem %s24_s12, 256  ;;  %p3952_p6 = scmp.lt.s32.totalorder %s24_s12, %s24_s12 }
  0x10   :  { %p3948_p5 = scmp.ne.s32.totalorder %s24_s12, %s3947_s18  ;;  %p3953_p7 = scmp.lt.s32.totalorder %s3947_s18, %s3947_s18 }
  0x12   :  { %p3954_p8 = por %p3953_p7, %p3952_p6 }
  0x14   :  { %p3955_p9 = pnand %p3954_p8, %p3948_p5 }
  0x16   :  { %3958 = shalt.err (!%p3955_p9)
}
  0x17   :  { %29 = dma.hbm_to_vmem [thread:$0]  %s4614_s0, 256, %s24_s12, [#allocation3], %s4029_s14, %s4029_s14, %s4030_s15  }
  0x18   :  { %s4031_s21 = smov [#allocation7]   ;;  %s4032_s23 = smov [#allocation8]  }
  0x19   :  { %s55_s22 = sshll.u32 %s4031_s21, 4  ;;  %s69_s24 = sshll.u32 %s4032_s23, 4  ;;  %s56_s22 = int_to_ptr.vmem [resolvable:$true] %s55_s22  ;;  %s70_s24 = int_to_ptr.vmem [resolvable:$true] %s69_s24 }
  0x1a   :  { %s3967_s1 = scalar_lea.vmem %s56_s22, 512  ;;  %p3972_p11 = scmp.lt.s32.totalorder %s56_s22, %s56_s22 }
  0x1b   :  { %p3968_p10 = scmp.ne.s32.totalorder %s56_s22, %s3967_s1  ;;  %p3973_p12 = scmp.lt.s32.totalorder %s3967_s1, %s3967_s1 }
  0x1d   :  { %p3974_p13 = por %p3973_p12, %p3972_p11 }
  0x1f   :  { %p3975_p0 = pnand %p3974_p13, %p3968_p10 }
  0x21   :  { %3978 = shalt.err (!%p3975_p0)
}
  0x22   :  { %61 = dma.hbm_to_vmem [thread:$0]  %s4620_s6, 512, %s56_s22, [#allocation6], %s4029_s14, %s4029_s14, %s4030_s15  }
  0x23   :  { %s3987_s0 = scalar_lea.vmem %s70_s24, 256  ;;  %p3992_p2 = scmp.lt.s32.totalorder %s70_s24, %s70_s24 }
  0x24   :  { %p3988_p1 = scmp.ne.s32.totalorder %s70_s24, %s3987_s0  ;;  %p3993_p3 = scmp.lt.s32.totalorder %s3987_s0, %s3987_s0 }
  0x26   :  { %p3994_p4 = por %p3993_p3, %p3992_p2 }
  0x28   :  { %p3995_p5 = pnand %p3994_p4, %p3988_p1 }
  0x2a   :  { %3998 = shalt.err (!%p3995_p5)
}
  0x2b   :  { %75 = dma.hbm_to_vmem [thread:$0]  %s4622_s8, 256, %s70_s24, [#allocation9], %s4029_s14, %s4029_s14, %s4030_s15  }
  0x2c   :  { %4019 = dma.done.wait [#allocation3], 256  }
  0x2d   :  { %4020 = vsyncadd [#allocation3], 4294967040 }
  0x2e   :  { %4021 = dma.done.wait [#allocation6], 768  }
  0x2f   :  { %4022 = vsyncadd [#allocation6], 4294966528 }
  0x30   :  { %4023 = dma.done.wait [#allocation9], 256  }
  0x31   :  { %4024 = vsyncadd [#allocation9], 4294967040  ;;  %vm126_vm0 = vcmask 261120   ;;  %v88_v0 = vld [vmem:[#allocation2] sm:$0xff]  ;;  %v89_v1 = vld [vmem:[#allocation2 + $0x8] sm:$0xff]  ;;  %v4033_v18 = vmov 0.0   ;;  %v92_v59 = vlaneseq }
  0x32   :  { %v127_v2 = vsel %vm126_vm0, %v88_v0, 0.0  ;;  %v130_v3 = vsel %vm126_vm0, %v89_v1, 0.0  ;;  %v173_v14 = vld [vmem:[%s4617_s3 + $0x38] sm:$0xff]  ;;  %v172_v15 = vld [vmem:[%s4617_s3 + $0x30] sm:$0xff]  ;;  %v171_v16 = vld [vmem:[%s4617_s3 + $0x28] sm:$0xff]  ;;  %244 = vmatprep.mubr.f32.mxu0 %v4033_v18  ;;  %3614 = vmatprep.subr.mxu1 %v4033_v18  ;;  %vm4034_vm1 = vmmov 0  }
  0x33   :  { %128 = vadd.xlane.f32.xlu0 %v127_v2  ;;  %204 = vmatprep.subr.mxu0 %v173_v14  ;;  %v170_v17 = vld [vmem:[%s4617_s3 + $0x20] sm:$0xff]  ;;  %v169_v19 = vld [vmem:[%s4617_s3 + $0x18] sm:$0xff]  ;;  %v168_v20 = vld [vmem:[%s4617_s3 + $0x10] sm:$0xff]  ;;  %s4036_s24 = smov 112   ;;  %s4037_s1 = smov 104   ;;  %vm296_vm2 = vcmask 64512  }
  0x34   :  { %205 = vmatpush1.msra.mxu0 %v172_v15  ;;  %v167_v21 = vld [vmem:[%s4617_s3 + $0x8] sm:$0xff]  ;;  %v166_v22 = vld [vmem:[%s4617_s3] sm:$0xff]  ;;  %3616 = vmatprep.mubr.msk.f32.mxu1 %vm4034_vm1, %v4033_v18  ;;  %s4035_s3 = smov 120   ;;  %s4038_s25 = smov 96   ;;  %v4224_v60 = vshrl.u32 %v92_v59, 7  ;;  %v95_v61 = vand.u32 127, %v92_v59 }
  0x35   :  { %206 = vmatprep.subr.mxu0 %v171_v16  ;;  %v3446_v30 = vld [vmem:[#allocation8] ss:$0 sm:$0xff]  ;;  %v3447_v32 = vld [vmem:[#allocation8 + $0x1] ss:$0 sm:$0xff]  ;;  %v3450_v39 = vld [vmem:[#allocation8 + $0x6] ss:$0 sm:$0xff] }
  0x36   :  { %207 = vmatpush1.msra.mxu0 %v170_v17  ;;  %vm96_vm3 = vcmp.ge.s32.totalorder %v4224_v60, %v95_v61  ;;  %v4039_v63 = vmov -inf   ;;  %s4040_s26 = smov 64   ;;  %s4041_s0 = smov 32  }
  0x37   :  { %131 = vadd.xlane.f32.xlu0 %v130_v3  ;;  %208 = vmatprep.subr.mxu0 %v169_v19 }
  0x38   :  { %209 = vmatpush1.msra.mxu0 %v168_v20 }
  0x39   :  { %210 = vmatprep.subr.mxu0 %v167_v21 }
  0x3a   :  { %211 = vmatpush1.msra.mxu0 %v166_v22 }
  0x3b   :  { %3609 = vmatprep.subr.mxu0 %v4033_v18 }
  0xbc   :  { %v129_v4 = vpop.xlane.xlu0 %128 }
  0xbd   :  { %v134_v5 = vmul.f32 0.03125, %v129_v4 }
  0xbf   :  { %v136_v6 = vsub.f32 %v88_v0, %v134_v5  ;;  %v97_v0 = vsel %vm96_vm3, 0.0, %v4039_v63 }
  0xc0   :  { %v132_v7 = vpop.xlane.xlu0 %131 }
  0xc1   :  { %v135_v8 = vmul.f32 0.03125, %v132_v7  ;;  %v138_v9 = vmul.f32 %v136_v6, %v136_v6 }
  0xc3   :  { %v137_v10 = vsub.f32 %v89_v1, %v135_v8  ;;  %v140_v11 = vsel %vm126_vm0, %v138_v9, 0.0 }
  0xc4   :  { %141 = vadd.xlane.f32.xlu1 %v140_v11 }
  0xc5   :  { %v139_v12 = vmul.f32 %v137_v10, %v137_v10 }
  0xc7   :  { %v143_v13 = vsel %vm126_vm0, %v139_v12, 0.0 }
  0xc8   :  { %144 = vadd.xlane.f32.xlu1 %v143_v13 }
 0x14d   :  { %v142_v23 = vpop.xlane.xlu1 %141 }
 0x14e   :  { %v146_v24 = vmul.f32 0.03125, %v142_v23 }
 0x150   :  { %v148_v25 = vadd.f32 1e-05, %v146_v24 }
 0x151   :  { %v145_v26 = vpop.xlane.xlu1 %144 }
 0x152   :  { %3843 = vrsqrt.f32 %v148_v25  ;;  %v147_v27 = vmul.f32 0.03125, %v145_v26 }
 0x154   :  { %v149_v28 = vadd.f32 1e-05, %v147_v27 }
 0x156   :  { %3845 = vrsqrt.f32 %v149_v28 }
 0x15f   :  { %v3844_v29 = vpop.eup %3843 }
 0x160   :  { %v152_v31 = vmul.f32 %v3844_v29, %v136_v6 }
 0x162   :  { %v158_v33 = vmul.f32 %v3446_v30, %v152_v31 }
 0x163   :  { %v3846_v34 = vpop.eup %3845 }
 0x164   :  { %v4149_v35 = vadd.f32 %v3447_v32, %v158_v33  ;;  %v153_v36 = vmul.f32 %v3846_v34, %v137_v10 }
 0x166   :  { %3448 = vmatmul.mubr.msk.f32.vlgmr.msra.gmra.mxu0 %vm126_vm0, %v4149_v35  ;;  %v159_v37 = vmul.f32 %v3446_v30, %v153_v36 }
 0x167   :  { %250 = vmatprep.mubr.f32.mxu0 %v4033_v18 }
 0x168   :  { %v4154_v38 = vadd.f32 %v3447_v32, %v159_v37 }
 0x16a   :  { %3449 = vmatmul.mubr.msk.f32.gmra.mxu0 %vm126_vm0, %v4154_v38 }
 0x16b   :  { %3611 = vmatprep.mubr.msk.f32.mxu0 %vm4034_vm1, %v4033_v18 }
 0x226   :  { %v4158_v40 = vpop.f32.mrf.mxu0 }
 0x227   :  { %v262_v41 = vadd.f32 %v3450_v39, %v4158_v40 }
 0x228   :  { %v4165_v42 = vpop.f32.mrf.mxu0 }
 0x229   :  { %266 = vrot.lane.b32.xlu0 %v262_v41, %s4035_s3  ;;  %270 = vrot.lane.b32.xlu1 %v262_v41, %s4036_s24 }
 0x22a   :  { %v4169_v43 = vpop.f32.mrf.mxu0 }
 0x22b   :  { %v263_v44 = vadd.f32 %v3450_v39, %v4169_v43 }
 0x22c   :  { %v254_v62 = vpop.f32.mrf.mxu0 }
 0x22d   :  { %274 = vrot.lane.b32.xlu0 %v262_v41, %s4037_s1  ;;  %268 = vrot.lane.b32.xlu1 %v263_v44, %s4035_s3 }
 0x231   :  { %294 = vrot.lane.b32.xlu0 %v262_v41, %s4038_s25  ;;  %272 = vrot.lane.b32.xlu1 %v263_v44, %s4036_s24 }
 0x235   :  { %276 = vrot.lane.b32.xlu1 %v263_v44, %s4037_s1 }
 0x239   :  { %371 = vrot.lane.b32.xlu1 %v263_v44, %s4038_s25 }
 0x29b   :  { %v271_v45 = vpop.permute.xlu1 %270  ;;  %v267_v46 = vpop.permute.xlu0 %266 }
 0x29c   :  { %447 = vrot.lane.b32.xlu0 %v267_v46, %s4038_s25 }
 0x29f   :  { %v269_v47 = vpop.permute.xlu1 %268  ;;  %v275_v48 = vpop.permute.xlu0 %274 }
 0x2a0   :  { %523 = vrot.lane.b32.xlu1 %v269_v47, %s4038_s25  ;;  %599 = vrot.lane.b32.xlu0 %v271_v45, %s4038_s25 }
 0x2a3   :  { %v273_v49 = vpop.permute.xlu1 %272  ;;  %v295_v50 = vpop.permute.xlu0 %294 }
 0x2a4   :  { %675 = vrot.lane.b32.xlu1 %v273_v49, %s4038_s25  ;;  %751 = vrot.lane.b32.xlu0 %v275_v48, %s4038_s25 }
 0x2a5   :  { %3610 = vmatpush3.xpose.msk.msra.mxu0 %vm296_vm2, %v295_v50 }
 0x2a6   :  { %3624 = vmatprep.subr.mxu0 %v4033_v18 }
 0x2a7   :  { %v277_v51 = vpop.permute.xlu1 %276 }
 0x2a8   :  { %3612 = vmatmul.mubr.msk.f32.vlgmr.msra.gmra.mxu0 %vm296_vm2, %v262_v41  ;;  %827 = vrot.lane.b32.xlu1 %v277_v51, %s4038_s25 }
 0x2a9   :  { %3626 = vmatprep.mubr.msk.f32.mxu0 %vm4034_vm1, %v4033_v18 }
 0x2ab   :  { %v372_v52 = vpop.permute.xlu1 %371 }
 0x2ac   :  { %3615 = vmatpush3.xpose.msk.msra.mxu1 %vm296_vm2, %v372_v52 }
 0x2ad   :  { %3619 = vmatprep.subr.mxu1 %v4033_v18 }
 0x2af   :  { %3617 = vmatmul.mubr.msk.f32.vlgmr.msra.gmra.mxu1 %vm296_vm2, %v263_v44 }
 0x2b0   :  { %3621 = vmatprep.mubr.msk.f32.mxu1 %vm4034_vm1, %v4033_v18 }
 0x30e   :  { %v448_v53 = vpop.permute.xlu0 %447 }
 0x30f   :  { %3620 = vmatpush3.xpose.msk.msra.mxu1 %vm296_vm2, %v448_v53 }
 0x310   :  { %3629 = vmatprep.subr.mxu1 %v4033_v18 }
 0x312   :  { %v524_v54 = vpop.permute.xlu1 %523  ;;  %3622 = vmatmul.mubr.msk.f32.vlgmr.msra.gmra.mxu1 %vm296_vm2, %v267_v46  ;;  %v600_v55 = vpop.permute.xlu0 %599 }
 0x313   :  { %3625 = vmatpush3.xpose.msk.msra.mxu0 %vm296_vm2, %v524_v54  ;;  %3630 = vmatpush3.xpose.msk.msra.mxu1 %vm296_vm2, %v600_v55 }
 0x314   :  { %3631 = vmatprep.mubr.msk.f32.mxu1 %vm4034_vm1, %v4033_v18  ;;  %3634 = vmatprep.subr.mxu0 %v4033_v18 }
 0x315   :  { %3639 = vmatprep.subr.mxu1 %v4033_v18 }
 0x316   :  { %v676_v56 = vpop.permute.xlu1 %675  ;;  %3627 = vmatmul.mubr.msk.f32.vlgmr.msra.gmra.mxu0 %vm296_vm2, %v269_v47  ;;  %3632 = vmatmul.mubr.msk.f32.vlgmr.msra.gmra.mxu1 %vm296_vm2, %v271_v45  ;;  %v752_v57 = vpop.permute.xlu0 %751 }
 0x317   :  { %3635 = vmatpush3.xpose.msk.msra.mxu0 %vm296_vm2, %v676_v56  ;;  %3640 = vmatpush3.xpose.msk.msra.mxu1 %vm296_vm2, %v752_v57 }
 0x318   :  { %3636 = vmatprep.mubr.msk.f32.mxu0 %vm4034_vm1, %v4033_v18  ;;  %3641 = vmatprep.mubr.msk.f32.mxu1 %vm4034_vm1, %v4033_v18 }
 0x319   :  { %3644 = vmatprep.subr.mxu0 %v4033_v18  ;;  %3649 = vmatprep.subr.mxu1 %v4033_v18 }
 0x31a   :  { %v828_v58 = vpop.permute.xlu1 %827  ;;  %3637 = vmatmul.mubr.msk.f32.vlgmr.msra.gmra.mxu0 %vm296_vm2, %v273_v49  ;;  %3642 = vmatmul.mubr.msk.f32.vlgmr.msra.gmra.mxu1 %vm296_vm2, %v275_v48 }
 0x31b   :  { %3645 = vmatpush3.xpose.msk.msra.mxu0 %vm296_vm2, %v828_v58  ;;  %3646 = vmatprep.mubr.msk.f32.mxu0 %vm4034_vm1, %v4033_v18 }
 0x31c   :  { %3654 = vmatprep.subr.mxu0 %v4033_v18  ;;  %3651 = vmatprep.mubr.msk.f32.mxu1 %vm4034_vm1, %v4033_v18 }
 0x31e   :  { %3647 = vmatmul.mubr.msk.f32.vlgmr.msra.gmra.mxu0 %vm296_vm2, %v277_v51 }
 0x31f   :  { %3656 = vmatprep.mubr.msk.f32.mxu0 %vm4034_vm1, %v4033_v18 }
 0x368   :  { %v367_v1 = vpop.f32.mrf.mxu0 }
 0x369   :  { %v4227_v2 = vadd.f32 %v367_v1, %v97_v0 }
 0x36a   :  { %v3613_v3 = vpop.f32.mrf.mxu0 }
 0x36b   :  { %v903_v4 = vsel %vm296_vm2, %v4227_v2, -inf }
 0x36c   :  { %904 = vmax.xlane.f32.xlu0 %v903_v4 }
 0x36f   :  { %v443_v5 = vpop.f32.mrf.mxu1 }
 0x370   :  { %v4231_v6 = vadd.f32 %v443_v5, %v97_v0 }
 0x371   :  { %v3618_v7 = vpop.f32.mrf.mxu1 }
 0x372   :  { %v906_v8 = vsel %vm296_vm2, %v4231_v6, -inf }
 0x373   :  { %907 = vmax.xlane.f32.xlu1 %v906_v8 }
 0x3d2   :  { %v519_v9 = vpop.f32.mrf.mxu1 }
 0x3d3   :  { %v520_v10 = vadd.f32 %v519_v9, %v97_v0 }
 0x3d4   :  { %v3623_v11 = vpop.f32.mrf.mxu1 }
 0x3d5   :  { %v909_v12 = vsel %vm296_vm2, %v520_v10, -inf }
 0x3d6   :  { %v595_v13 = vpop.f32.mrf.mxu0  ;;  %910 = vmax.xlane.f32.xlu0 %v909_v12  ;;  %v671_v14 = vpop.f32.mrf.mxu1 }
 0x3d7   :  { %v596_v15 = vadd.f32 %v595_v13, %v97_v0  ;;  %v672_v19 = vadd.f32 %v671_v14, %v97_v0 }
 0x3d8   :  { %v3628_v16 = vpop.f32.mrf.mxu0  ;;  %v3633_v17 = vpop.f32.mrf.mxu1 }
 0x3d9   :  { %v912_v20 = vsel %vm296_vm2, %v596_v15, -inf  ;;  %v915_v28 = vsel %vm296_vm2, %v672_v19, -inf }
 0x3da   :  { %v747_v21 = vpop.f32.mrf.mxu0  ;;  %913 = vmax.xlane.f32.xlu0 %v912_v20  ;;  %v823_v22 = vpop.f32.mrf.mxu1 }
 0x3db   :  { %v4237_v23 = vadd.f32 %v747_v21, %v97_v0  ;;  %v824_v26 = vadd.f32 %v823_v22, %v97_v0 }
 0x3dc   :  { %v3638_v24 = vpop.f32.mrf.mxu0  ;;  %v3643_v25 = vpop.f32.mrf.mxu1 }
 0x3dd   :  { %v918_v27 = vsel %vm296_vm2, %v4237_v23, -inf  ;;  %v921_v31 = vsel %vm296_vm2, %v824_v26, -inf }
 0x3de   :  { %919 = vmax.xlane.f32.xlu1 %v918_v27  ;;  %v899_v29 = vpop.f32.mrf.mxu0  ;;  %916 = vmax.xlane.f32.xlu0 %v915_v28 }
 0x3df   :  { %v4253_v32 = vadd.f32 %v899_v29, %v97_v0 }
 0x3e0   :  { %v3648_v30 = vpop.f32.mrf.mxu0 }
 0x3e1   :  { %v924_v33 = vsel %vm296_vm2, %v4253_v32, -inf }
 0x3e2   :  { %922 = vmax.xlane.f32.xlu0 %v921_v31 }
 0x3ef   :  { %282 = vrot.lane.b32.xlu1 %v4169_v43, %s4038_s25 }
 0x3f3   :  { %286 = vrot.lane.b32.xlu1 %v4165_v42, %s4040_s26 }
 0x3f5   :  { %v905_v34 = vpop.xlane.xlu0 %904 }
 0x3f6   :  { %v927_v48 = vsub.f32 %v4227_v2, %v905_v34 }
 0x3f8   :  { %280 = vrot.lane.b32.xlu0 %v4158_v40, %s4038_s25  ;;  %v935_v49 = vmul.f32 1.442695, %v927_v48 }
 0x3fa   :  { %3847 = vpow2.f32 %v935_v49 }
 0x3fc   :  { %290 = vrot.lane.b32.xlu0 %v4165_v42, %s4041_s0  ;;  %v908_v37 = vpop.xlane.xlu1 %907 }
 0x400   :  { %991 = vrot.lane.b32.xlu0 %v4158_v40, %s4040_s26 }
 0x407   :  { %v3848_v58 = vpop.eup %3847 }
 0x408   :  { %v951_v59 = vsel %vm296_vm2, %v3848_v58, 0.0 }
 0x417   :  { %925 = vmax.xlane.f32.xlu1 %v924_v33 }
 0x428   :  { %288 = vrot.lane.b32.xlu1 %v254_v62, %s4040_s26 }
 0x42c   :  { %292 = vrot.lane.b32.xlu1 %v254_v62, %s4041_s0 }
 0x430   :  { %1067 = vrot.lane.b32.xlu1 %v4169_v43, %s4040_s26 }
 0x45f   :  { %v911_v36 = vpop.xlane.xlu0 %910 }
 0x460   :  { %v929_v50 = vsub.f32 %v520_v10, %v911_v36  ;;  %v928_v10 = vsub.f32 %v4231_v6, %v908_v37 }
 0x462   :  { %v939_v51 = vmul.f32 1.442695, %v929_v50  ;;  %v937_v11 = vmul.f32 1.442695, %v928_v10 }
 0x463   :  { %v914_v39 = vpop.xlane.xlu0 %913 }
 0x464   :  { %v930_v52 = vsub.f32 %v596_v15, %v914_v39  ;;  %3849 = vpow2.f32 %v939_v51 }
 0x466   :  { %v941_v53 = vmul.f32 1.442695, %v930_v52 }
 0x467   :  { %v920_v41 = vpop.xlane.xlu1 %919  ;;  %v917_v42 = vpop.xlane.xlu0 %916 }
 0x468   :  { %v931_v54 = vsub.f32 %v672_v19, %v917_v42  ;;  %3851 = vpow2.f32 %v941_v53  ;;  %v932_v12 = vsub.f32 %v4237_v23, %v920_v41 }
 0x46a   :  { %v943_v55 = vmul.f32 1.442695, %v931_v54  ;;  %v945_v13 = vmul.f32 1.442695, %v932_v12 }
 0x46b   :  { %v283_v40 = vpop.permute.xlu1 %282  ;;  %v923_v44 = vpop.xlane.xlu0 %922 }
 0x46c   :  { %v933_v56 = vsub.f32 %v824_v26, %v923_v44  ;;  %3853 = vpow2.f32 %v943_v55 }
 0x46e   :  { %v947_v57 = vmul.f32 1.442695, %v933_v56 }
 0x46f   :  { %v287_v45 = vpop.permute.xlu1 %286  ;;  %v281_v46 = vpop.permute.xlu0 %280 }
 0x470   :  { %1295 = vrot.lane.b32.xlu0 %v287_v45, %s4040_s26  ;;  %1143 = vrot.lane.b32.xlu1 %v281_v46, %s4040_s26  ;;  %3855 = vpow2.f32 %v947_v57 }
 0x471   :  { %v3850_v61 = vpop.eup %3849  ;;  %3857 = vpow2.f32 %v937_v11 }
 0x472   :  { %v957_v62 = vsel %vm296_vm2, %v3850_v61, 0.0  ;;  %3859 = vpow2.f32 %v945_v13 }
 0x473   :  { %v291_v47 = vpop.permute.xlu0 %290 }
 0x474   :  { %1219 = vrot.lane.b32.xlu1 %v283_v40, %s4040_s26 }
 0x475   :  { %v4268_v63 = vpop.eup %3851 }
 0x476   :  { %v960_v0 = vsel %vm296_vm2, %v4268_v63, 0.0 }
 0x477   :  { %v992_v43 = vpop.permute.xlu0 %991 }
 0x478   :  { %3650 = vmatpush3.msra.mxu1 %v992_v43 }
 0x479   :  { %3659 = vmatprep.subr.mxu1 %v4033_v18  ;;  %v3854_v1 = vpop.eup %3853 }
 0x47a   :  { %v963_v2 = vsel %vm296_vm2, %v3854_v1, 0.0 }
 0x47d   :  { %v3856_v3 = vpop.eup %3855 }
 0x47e   :  { %v969_v4 = vsel %vm296_vm2, %v3856_v3, 0.0  ;;  %v3858_v16 = vpop.eup %3857 }
 0x47f   :  { %v954_v17 = vsel %vm296_vm2, %v3858_v16, 0.0  ;;  %v4281_v19 = vpop.eup %3859 }
 0x480   :  { %v966_v6 = vsel %vm296_vm2, %v4281_v19, 0.0 }
 0x48f   :  { %952 = vadd.xlane.f32.xlu0 %v951_v59 }
 0x493   :  { %958 = vadd.xlane.f32.xlu0 %v957_v62 }
 0x497   :  { %961 = vadd.xlane.f32.xlu0 %v960_v0  ;;  %v3475_v0 = vld [vmem:[#allocation8 + $0x7] ss:$0 sm:$0xff] }
 0x49b   :  { %964 = vadd.xlane.f32.xlu0 %v963_v2 }
 0x49f   :  { %970 = vadd.xlane.f32.xlu0 %v969_v4 }
 0x4a0   :  { %v926_v5 = vpop.xlane.xlu1 %925 }
 0x4a1   :  { %v934_v14 = vsub.f32 %v4253_v32, %v926_v5 }
 0x4a3   :  { %v949_v15 = vmul.f32 1.442695, %v934_v14 }
 0x4a4   :  { %v289_v7 = vpop.permute.xlu1 %288 }
 0x4a5   :  { %1371 = vrot.lane.b32.xlu1 %v289_v7, %s4040_s26  ;;  %3861 = vpow2.f32 %v949_v15 }
 0x4a8   :  { %v293_v8 = vpop.permute.xlu1 %292 }
 0x4ac   :  { %v1068_v9 = vpop.permute.xlu1 %1067 }
 0x4ad   :  { %3655 = vmatpush3.msra.mxu0 %v1068_v9 }
 0x4ae   :  { %3664 = vmatprep.subr.mxu0 %v4033_v18 }
 0x4b2   :  { %v4285_v20 = vpop.eup %3861 }
 0x4b3   :  { %v972_v21 = vsel %vm296_vm2, %v4285_v20, 0.0 }
 0x4b5   :  { %1447 = vrot.lane.b32.xlu0 %v291_v47, %s4040_s26 }
 0x4c9   :  { %955 = vadd.xlane.f32.xlu1 %v954_v17 }
 0x4cd   :  { %967 = vadd.xlane.f32.xlu1 %v966_v6 }
 0x4d1   :  { %973 = vadd.xlane.f32.xlu1 %v972_v21 }
 0x4e2   :  { %1523 = vrot.lane.b32.xlu1 %v293_v8, %s4040_s26  ;;  %v1296_v22 = vpop.permute.xlu0 %1295  ;;  %v1144_v30 = vpop.permute.xlu1 %1143 }
 0x4e6   :  { %v1220_v41 = vpop.permute.xlu1 %1219 }
 0x517   :  { %v1372_v42 = vpop.permute.xlu1 %1371 }
 0x518   :  { %v953_v23 = vpop.xlane.xlu0 %952 }
 0x519   :  { %3863 = vrcp.f32 %v953_v23 }
 0x51c   :  { %v959_v24 = vpop.xlane.xlu0 %958 }
 0x51d   :  { %3865 = vrcp.f32 %v959_v24 }
 0x520   :  { %v962_v25 = vpop.xlane.xlu0 %961 }
 0x524   :  { %v965_v26 = vpop.xlane.xlu0 %964 }
 0x525   :  { %3867 = vrcp.f32 %v965_v26 }
 0x526   :  { %v3864_v27 = vpop.eup %3863 }
 0x527   :  { %v983_v28 = vmul.f32 %v3864_v27, %v3848_v58 }
 0x528   :  { %v971_v29 = vpop.xlane.xlu0 %970 }
 0x529   :  { %3869 = vrcp.f32 %v971_v29  ;;  %3652 = vmatmul.mubr.msk.f32.vlgmr.msra.gmra.mxu1 %vm296_vm2, %v983_v28 }
 0x52a   :  { %v3866_v31 = vpop.eup %3865  ;;  %3660 = vmatpush3.msra.mxu1 %v1144_v30  ;;  %3661 = vmatprep.mubr.msk.f32.mxu1 %vm4034_vm1, %v4033_v18  ;;  %v1656_v30 = vld [vmem:[%s4618_s4 + $0x10] sm:$0xff] }
 0x52b   :  { %3669 = vmatprep.subr.mxu1 %v4033_v18  ;;  %v985_v32 = vmul.f32 %v3866_v31, %v3850_v61  ;;  %v1655_v31 = vld [vmem:[%s4618_s4 + $0x8] sm:$0xff] }
 0x52c   :  { %v1448_v36 = vpop.permute.xlu0 %1447 }
 0x52d   :  { %3662 = vmatmul.mubr.msk.f32.vlgmr.msra.gmra.mxu1 %vm296_vm2, %v985_v32  ;;  %v1654_v32 = vld [vmem:[%s4618_s4] sm:$0xff] }
 0x52e   :  { %3670 = vmatpush3.msra.mxu1 %v1296_v22  ;;  %3671 = vmatprep.mubr.msk.f32.mxu1 %vm4034_vm1, %v4033_v18 }
 0x52f   :  { %3679 = vmatprep.subr.mxu1 %v4033_v18 }
 0x532   :  { %v3868_v33 = vpop.eup %3867 }
 0x533   :  { %v987_v34 = vmul.f32 %v3868_v33, %v3854_v1  ;;  %v1751_v33 = vld [vmem:[%s4619_s5 + $0x38] sm:$0xff] }
 0x535   :  { %3672 = vmatmul.mubr.msk.f32.vlgmr.msra.gmra.mxu1 %vm296_vm2, %v987_v34 }
 0x536   :  { %v3870_v37 = vpop.eup %3869  ;;  %3680 = vmatpush3.msra.mxu1 %v1448_v36  ;;  %3681 = vmatprep.mubr.msk.f32.mxu1 %vm4034_vm1, %v4033_v18 }
 0x537   :  { %v989_v39 = vmul.f32 %v3870_v37, %v3856_v3  ;;  %3700 = vmatprep.subr.mxu1 %v4033_v18 }
 0x539   :  { %3682 = vmatmul.mubr.msk.f32.vlgmr.msra.gmra.mxu1 %vm296_vm2, %v989_v39 }
 0x53a   :  { %3702 = vmatprep.mubr.msk.f32.mxu1 %vm4034_vm1, %v4033_v18 }
 0x552   :  { %v956_v40 = vpop.xlane.xlu1 %955 }
 0x553   :  { %3871 = vrcp.f32 %v956_v40  ;;  %v3477_v40 = vld [vmem:[#allocation8 + $0x3] ss:$0 sm:$0xff] }
 0x554   :  { %3873 = vrcp.f32 %v962_v25 }
 0x556   :  { %v968_v44 = vpop.xlane.xlu1 %967 }
 0x557   :  { %3875 = vrcp.f32 %v968_v44 }
 0x55a   :  { %v974_v45 = vpop.xlane.xlu1 %973 }
 0x55b   :  { %3877 = vrcp.f32 %v974_v45 }
 0x55e   :  { %v1524_v52 = vpop.permute.xlu1 %1523 }
 0x560   :  { %v3872_v46 = vpop.eup %3871 }
 0x561   :  { %v984_v47 = vmul.f32 %v3872_v46, %v3858_v16  ;;  %v3874_v48 = vpop.eup %3873 }
 0x562   :  { %v986_v43 = vmul.f32 %v3874_v48, %v4268_v63 }
 0x563   :  { %3657 = vmatmul.mubr.msk.f32.vlgmr.msra.gmra.mxu0 %vm296_vm2, %v984_v47 }
 0x564   :  { %3665 = vmatpush3.msra.mxu0 %v1220_v41  ;;  %3666 = vmatprep.mubr.msk.f32.mxu0 %vm4034_vm1, %v4033_v18  ;;  %v3876_v49 = vpop.eup %3875  ;;  %v3476_v41 = vld [vmem:[#allocation8 + $0x2] ss:$0 sm:$0xff] }
 0x565   :  { %3674 = vmatprep.subr.mxu0 %v4033_v18  ;;  %v988_v50 = vmul.f32 %v3876_v49, %v4281_v19 }
 0x567   :  { %3667 = vmatmul.mubr.msk.f32.vlgmr.msra.gmra.mxu0 %vm296_vm2, %v986_v43 }
 0x568   :  { %3675 = vmatpush3.msra.mxu0 %v1372_v42  ;;  %3676 = vmatprep.mubr.msk.f32.mxu0 %vm4034_vm1, %v4033_v18  ;;  %v3878_v51 = vpop.eup %3877 }
 0x569   :  { %3684 = vmatprep.subr.mxu0 %v4033_v18  ;;  %v990_v53 = vmul.f32 %v3878_v51, %v4285_v20 }
 0x56b   :  { %3677 = vmatmul.mubr.msk.f32.vlgmr.msra.gmra.mxu0 %vm296_vm2, %v988_v50 }
 0x56c   :  { %3685 = vmatpush3.msra.mxu0 %v1524_v52  ;;  %3686 = vmatprep.mubr.msk.f32.mxu0 %vm4034_vm1, %v4033_v18  ;;  %v1750_v52 = vld [vmem:[%s4619_s5 + $0x30] sm:$0xff] }
 0x56f   :  { %3687 = vmatmul.mubr.msk.f32.vlgmr.msra.gmra.mxu0 %vm296_vm2, %v990_v53  ;;  %v1749_v53 = vld [vmem:[%s4619_s5 + $0x28] sm:$0xff] }
 0x5e9   :  { %v1063_v54 = vpop.f32.mrf.mxu1 }
 0x5eb   :  { %v3653_v55 = vpop.f32.mrf.mxu1 }
 0x5ec   :  { %v1747_v55 = vld [vmem:[%s4619_s5 + $0x18] sm:$0xff] }
 0x5ed   :  { %v1215_v56 = vpop.f32.mrf.mxu1 }
 0x5ee   :  { %v1599_v59 = vadd.f32 %v1215_v56, %v1063_v54  ;;  %v1748_v54 = vld [vmem:[%s4619_s5 + $0x20] sm:$0xff]  ;;  %v1746_v56 = vld [vmem:[%s4619_s5 + $0x10] sm:$0xff] }
 0x5ef   :  { %v3663_v57 = vpop.f32.mrf.mxu1 }
 0x5f0   :  { %v1745_v57 = vld [vmem:[%s4619_s5 + $0x8] sm:$0xff] }
 0x5f5   :  { %v1367_v58 = vpop.f32.mrf.mxu1 }
 0x5f6   :  { %v1601_v62 = vadd.f32 %v1599_v59, %v1367_v58  ;;  %v1744_v58 = vld [vmem:[%s4619_s5] sm:$0xff]  ;;  %v90_v59 = vld [vmem:[#allocation5] sm:$0xff] }
 0x5f7   :  { %v3673_v61 = vpop.f32.mrf.mxu1 }
 0x5f8   :  { %v91_v61 = vld [vmem:[#allocation5 + $0x8] sm:$0xff] }
 0x5f9   :  { %v1519_v63 = vpop.f32.mrf.mxu1 }
 0x5fa   :  { %v1603_v1 = vadd.f32 %v1601_v62, %v1519_v63  ;;  %v3478_v62 = vld [vmem:[#allocation8 + $0x8] ss:$0 sm:$0xff] }
 0x5fb   :  { %v3683_v2 = vpop.f32.mrf.mxu1 }
 0x5fc   :  { %v1610_v3 = vadd.f32 %v3475_v0, %v1603_v1 }
 0x5fe   :  { %v1612_v4 = vadd.f32 %v1610_v3, %v4149_v35  ;;  %v3483_v3 = vld [vmem:[#allocation8 + $0x9] ss:$0 sm:$0xff] }
 0x600   :  { %v1616_v5 = vsel %vm126_vm0, %v1612_v4, 0.0 }
 0x601   :  { %1617 = vadd.xlane.f32.xlu0 %v1616_v5 }
 0x623   :  { %v1139_v7 = vpop.f32.mrf.mxu0 }
 0x625   :  { %v3658_v8 = vpop.f32.mrf.mxu0 }
 0x627   :  { %v1291_v9 = vpop.f32.mrf.mxu0 }
 0x628   :  { %v1600_v12 = vadd.f32 %v1291_v9, %v1139_v7 }
 0x629   :  { %v3668_v10 = vpop.f32.mrf.mxu0 }
 0x62b   :  { %v1443_v11 = vpop.f32.mrf.mxu0 }
 0x62c   :  { %v1602_v14 = vadd.f32 %v1600_v12, %v1443_v11 }
 0x62d   :  { %v3678_v13 = vpop.f32.mrf.mxu0 }
 0x62f   :  { %v1595_v15 = vpop.f32.mrf.mxu0 }
 0x630   :  { %v1604_v16 = vadd.f32 %v1602_v14, %v1595_v15 }
 0x631   :  { %v3688_v17 = vpop.f32.mrf.mxu0 }
 0x632   :  { %v1611_v19 = vadd.f32 %v3475_v0, %v1604_v16 }
 0x634   :  { %v1613_v6 = vadd.f32 %v1611_v19, %v4154_v38  ;;  %v1657_v38 = vld [vmem:[%s4618_s4 + $0x18] sm:$0xff] }
 0x635   :  { %3689 = vmatprep.subr.mxu0 %v1657_v38 }
 0x636   :  { %v1619_v20 = vsel %vm126_vm0, %v1613_v6, 0.0  ;;  %3690 = vmatpush3.msra.mxu0 %v1657_v38 }
 0x637   :  { %1620 = vadd.xlane.f32.xlu1 %v1619_v20  ;;  %3691 = vmatprep.subr.mxu0 %v1656_v30 }
 0x638   :  { %3692 = vmatpush3.msra.mxu0 %v1656_v30 }
 0x639   :  { %3693 = vmatprep.subr.mxu0 %v1655_v31 }
 0x63a   :  { %3694 = vmatpush3.msra.mxu0 %v1655_v31 }
 0x63b   :  { %3695 = vmatprep.subr.mxu0 %v1654_v32 }
 0x63c   :  { %3696 = vmatpush3.msra.mxu0 %v1654_v32 }
 0x63d   :  { %1782 = vmatprep.subr.mxu0 %v1751_v33 }
 0x68a   :  { %v1618_v35 = vpop.xlane.xlu0 %1617 }
 0x68b   :  { %v1622_v21 = vmul.f32 0.03125, %v1618_v35 }
 0x68d   :  { %v1624_v22 = vsub.f32 %v1612_v4, %v1622_v21  ;;  %v4042_v21 = vmov 1966171168  }
 0x68f   :  { %v1626_v23 = vmul.f32 %v1624_v22, %v1624_v22 }
 0x691   :  { %v1628_v24 = vsel %vm126_vm0, %v1626_v23, 0.0  ;;  %v98_v23 = vld [vmem:[%s4616_s2] sm:$0x3] }
 0x692   :  { %1629 = vadd.xlane.f32.xlu0 %v1628_v24  ;;  %vm99_vm4 = vcmp.eq.f32.partialorder %v98_v23, 0.0 }
 0x6c0   :  { %v1621_v25 = vpop.xlane.xlu1 %1620 }
 0x6c1   :  { %v1623_v26 = vmul.f32 0.03125, %v1621_v25 }
 0x6c3   :  { %v1625_v27 = vsub.f32 %v1613_v6, %v1623_v26  ;;  %v100_v26 = vsel %vm99_vm4, -inf, %v4033_v18 }
 0x6c5   :  { %v1627_v28 = vmul.f32 %v1625_v27, %v1625_v27 }
 0x6c7   :  { %v1631_v29 = vsel %vm126_vm0, %v1627_v28, 0.0 }
 0x6c8   :  { %1632 = vadd.xlane.f32.xlu0 %v1631_v29  ;;  %v1888_v29 = vsub.s32 0, %v4224_v60 }
 0x71b   :  { %v1630_v34 = vpop.xlane.xlu0 %1629 }
 0x71c   :  { %v1634_v36 = vmul.f32 0.03125, %v1630_v34 }
 0x71e   :  { %v1636_v37 = vadd.f32 1e-05, %v1634_v36 }
 0x720   :  { %3879 = vrsqrt.f32 %v1636_v37 }
 0x72d   :  { %v3880_v39 = vpop.eup %3879 }
 0x72e   :  { %v1640_v42 = vmul.f32 %v3880_v39, %v1624_v22  ;;  %v103_v22 = vunpack.c.l.s4 %v4042_v21 }
 0x730   :  { %v1646_v44 = vmul.f32 %v3476_v41, %v1640_v42  ;;  %v104_v24 = vunpack.c.0.s8 %v103_v22 }
 0x732   :  { %v4341_v45 = vadd.f32 %v3477_v40, %v1646_v44  ;;  %v107_v25 = vsub.s32 %v104_v24, %v4224_v60 }
 0x734   :  { %3697 = vmatprep.mubr.msk.f32.mxu0 %vm126_vm0, %v4341_v45 }
 0x751   :  { %v1633_v46 = vpop.xlane.xlu0 %1632 }
 0x752   :  { %v1635_v47 = vmul.f32 0.03125, %v1633_v46 }
 0x754   :  { %v1637_v48 = vadd.f32 1e-05, %v1635_v47 }
 0x756   :  { %3881 = vrsqrt.f32 %v1637_v48 }
 0x763   :  { %v3882_v43 = vpop.eup %3881 }
 0x764   :  { %v1641_v49 = vmul.f32 %v3882_v43, %v1625_v27  ;;  %v108_v27 = vrot.slane %v100_v26, %v107_v25 }
 0x766   :  { %v1647_v50 = vmul.f32 %v3476_v41, %v1641_v49  ;;  %v116_v28 = vrot.slane %v108_v27, %v107_v25  ;;  %v109_v38 = vcombine.high %v108_v27, %v108_v27 }
 0x768   :  { %v4345_v51 = vadd.f32 %v3477_v40, %v1647_v50  ;;  %v1889_v30 = vrot.slane %v116_v28, %v1888_v29  ;;  %v123_v31 = vrot.slane %v109_v38, %v107_v25 }
 0x76a   :  { %3698 = vmatmul.mubr.msk.f32.vlgmr.msra.gmra.mxu0 %vm126_vm0, %v4345_v51  ;;  %v1893_v34 = vrot.slane %v123_v31, %v1888_v29 }
 0x76b   :  { %1783 = vmatpush1.msra.mxu0 %v1750_v52  ;;  %1822 = vmatprep.mubr.f32.mxu0 %v4033_v18 }
 0x76c   :  { %1784 = vmatprep.subr.mxu0 %v1749_v53 }
 0x76d   :  { %1785 = vmatpush1.msra.mxu0 %v1748_v54 }
 0x76e   :  { %1786 = vmatprep.subr.mxu0 %v1747_v55 }
 0x76f   :  { %1787 = vmatpush1.msra.mxu0 %v1746_v56 }
 0x770   :  { %1788 = vmatprep.subr.mxu0 %v1745_v57 }
 0x771   :  { %1789 = vmatpush1.msra.mxu0 %v1744_v58 }
 0x772   :  { %3481 = vmatmul.mubr.msk.f32.vlgmr.msra.gmra.mxu0 %vm126_vm0, %v90_v59  ;;  %3710 = vmatprep.subr.mxu0 %v4033_v18 }
 0x773   :  { %1828 = vmatprep.mubr.f32.mxu0 %v4033_v18 }
 0x776   :  { %3482 = vmatmul.mubr.msk.f32.gmra.mxu0 %vm126_vm0, %v91_v61 }
 0x777   :  { %3712 = vmatprep.mubr.msk.f32.mxu0 %vm4034_vm1, %v4033_v18 }
 0x82a   :  { %v3699_v63 = vpop.f32.mrf.mxu0 }
 0x82b   :  { %v1741_v0 = vadd.f32 %v3699_v63, %v3478_v62 }
 0x82c   :  { %v1735_v1 = vpop.f32.mrf.mxu0 }
 0x82d   :  { %v1736_v2 = vadd.f32 %v3478_v62, %v1735_v1  ;;  %1839 = vrot.lane.b32.xlu1 %v1741_v0, %s4035_s3 }
 0x82f   :  { %1841 = vrot.lane.b32.xlu0 %v1736_v2, %s4036_s24 }
 0x831   :  { %1843 = vrot.lane.b32.xlu1 %v1741_v0, %s4036_s24 }
 0x832   :  { %v4380_v4 = vpop.f32.mrf.mxu0 }
 0x833   :  { %v1854_v5 = vadd.f32 %v3483_v3, %v4380_v4 }
 0x834   :  { %v4383_v7 = vpop.f32.mrf.mxu0 }
 0x835   :  { %3701 = vmatpush3.xpose.msk.msra.mxu1 %vm296_vm2, %v1854_v5  ;;  %1858 = vrot.lane.b32.xlu0 %v1854_v5, %s4035_s3 }
 0x836   :  { %v4387_v8 = vpop.f32.mrf.mxu0  ;;  %1837 = vrot.lane.b32.xlu1 %v1736_v2, %s4035_s3  ;;  %3705 = vmatprep.subr.mxu1 %v4033_v18 }
 0x837   :  { %v1855_v9 = vadd.f32 %v3483_v3, %v4387_v8 }
 0x838   :  { %3703 = vmatmul.mubr.msk.f32.vlgmr.msra.gmra.mxu1 %vm296_vm2, %v1736_v2  ;;  %v1832_v60 = vpop.f32.mrf.mxu0 }
 0x839   :  { %1862 = vrot.lane.b32.xlu0 %v1854_v5, %s4036_s24  ;;  %3706 = vmatpush3.xpose.msk.msra.mxu1 %vm296_vm2, %v1855_v9 }
 0x83a   :  { %1860 = vrot.lane.b32.xlu1 %v1855_v9, %s4035_s3  ;;  %3707 = vmatprep.mubr.msk.f32.mxu1 %vm4034_vm1, %v4033_v18 }
 0x83b   :  { %3715 = vmatprep.subr.mxu1 %v4033_v18 }
 0x83c   :  { %3708 = vmatmul.mubr.msk.f32.vlgmr.msra.gmra.mxu1 %vm296_vm2, %v1741_v0 }
 0x83d   :  { %1866 = vrot.lane.b32.xlu0 %v1854_v5, %s4037_s1  ;;  %3717 = vmatprep.mubr.msk.f32.mxu1 %vm4034_vm1, %v4033_v18 }
 0x83e   :  { %1864 = vrot.lane.b32.xlu1 %v1855_v9, %s4036_s24 }
 0x841   :  { %1845 = vrot.lane.b32.xlu0 %v1736_v2, %s4037_s1 }
 0x842   :  { %1868 = vrot.lane.b32.xlu1 %v1855_v9, %s4037_s1 }
 0x846   :  { %1847 = vrot.lane.b32.xlu1 %v1741_v0, %s4037_s1 }
 0x89f   :  { %v1840_v10 = vpop.permute.xlu1 %1839 }
 0x8a1   :  { %v1842_v11 = vpop.permute.xlu0 %1841 }
 0x8a3   :  { %v1844_v12 = vpop.permute.xlu1 %1843 }
 0x8a7   :  { %v1859_v13 = vpop.permute.xlu0 %1858 }
 0x8a8   :  { %3711 = vmatpush3.xpose.msk.msra.mxu0 %vm296_vm2, %v1859_v13  ;;  %v1838_v14 = vpop.permute.xlu1 %1837 }
 0x8a9   :  { %3720 = vmatprep.subr.mxu0 %v4033_v18 }
 0x8ab   :  { %v1863_v15 = vpop.permute.xlu0 %1862  ;;  %3713 = vmatmul.mubr.msk.f32.vlgmr.msra.gmra.mxu0 %vm296_vm2, %v1838_v14 }
 0x8ac   :  { %3721 = vmatpush3.xpose.msk.msra.mxu0 %vm296_vm2, %v1863_v15  ;;  %v1861_v16 = vpop.permute.xlu1 %1860  ;;  %3722 = vmatprep.mubr.msk.f32.mxu0 %vm4034_vm1, %v4033_v18 }
 0x8ad   :  { %3716 = vmatpush3.xpose.msk.msra.mxu1 %vm296_vm2, %v1861_v16  ;;  %3730 = vmatprep.subr.mxu0 %v4033_v18 }
 0x8ae   :  { %3725 = vmatprep.subr.mxu1 %v4033_v18 }
 0x8af   :  { %v1867_v17 = vpop.permute.xlu0 %1866  ;;  %3723 = vmatmul.mubr.msk.f32.vlgmr.msra.gmra.mxu0 %vm296_vm2, %v1842_v11 }
 0x8b0   :  { %3731 = vmatpush3.xpose.msk.msra.mxu0 %vm296_vm2, %v1867_v17  ;;  %v1865_v19 = vpop.permute.xlu1 %1864  ;;  %3718 = vmatmul.mubr.msk.f32.vlgmr.msra.gmra.mxu1 %vm296_vm2, %v1840_v10 }
 0x8b1   :  { %3726 = vmatpush3.xpose.msk.msra.mxu1 %vm296_vm2, %v1865_v19  ;;  %3727 = vmatprep.mubr.msk.f32.mxu1 %vm4034_vm1, %v4033_v18 }
 0x8b2   :  { %3732 = vmatprep.mubr.msk.f32.mxu0 %vm4034_vm1, %v4033_v18  ;;  %3735 = vmatprep.subr.mxu1 %v4033_v18 }
 0x8b3   :  { %v1846_v6 = vpop.permute.xlu0 %1845  ;;  %3740 = vmatprep.subr.mxu0 %v4033_v18 }
 0x8b4   :  { %3733 = vmatmul.mubr.msk.f32.vlgmr.msra.gmra.mxu0 %vm296_vm2, %v1846_v6  ;;  %v1869_v20 = vpop.permute.xlu1 %1868  ;;  %3728 = vmatmul.mubr.msk.f32.vlgmr.msra.gmra.mxu1 %vm296_vm2, %v1844_v12 }
 0x8b5   :  { %3736 = vmatpush3.xpose.msk.msra.mxu1 %vm296_vm2, %v1869_v20  ;;  %3737 = vmatprep.mubr.msk.f32.mxu1 %vm4034_vm1, %v4033_v18 }
 0x8b6   :  { %3745 = vmatprep.subr.mxu1 %v4033_v18  ;;  %3742 = vmatprep.mubr.msk.f32.mxu0 %vm4034_vm1, %v4033_v18 }
 0x8b8   :  { %v1848_v35 = vpop.permute.xlu1 %1847 }
 0x8b9   :  { %3738 = vmatmul.mubr.msk.f32.vlgmr.msra.gmra.mxu1 %vm296_vm2, %v1848_v35 }
 0x8ba   :  { %3747 = vmatprep.mubr.msk.f32.mxu1 %vm4034_vm1, %v4033_v18 }
 0x8f8   :  { %v1966_v32 = vpop.f32.mrf.mxu1 }
 0x8f9   :  { %v4443_v33 = vadd.f32 %v1966_v32, %v1889_v30 }
 0x8fa   :  { %v3704_v36 = vpop.f32.mrf.mxu1 }
 0x8fb   :  { %v2488_v37 = vsel %vm296_vm2, %v4443_v33, -inf }
 0x8fc   :  { %2489 = vmax.xlane.f32.xlu0 %v2488_v37  ;;  %v2040_v39 = vpop.f32.mrf.mxu1 }
 0x8fd   :  { %v4447_v41 = vadd.f32 %v2040_v39, %v1893_v34 }
 0x8fe   :  { %v3709_v42 = vpop.f32.mrf.mxu1 }
 0x8ff   :  { %v2491_v40 = vsel %vm296_vm2, %v4447_v41, -inf }
 0x900   :  { %2492 = vmax.xlane.f32.xlu1 %v2491_v40 }
 0x96b   :  { %v2114_v44 = vpop.f32.mrf.mxu0 }
 0x96c   :  { %v2115_v46 = vadd.f32 %v2114_v44, %v1889_v30 }
 0x96d   :  { %v3714_v47 = vpop.f32.mrf.mxu0 }
 0x96e   :  { %v2494_v48 = vsel %vm296_vm2, %v2115_v46, -inf }
 0x96f   :  { %v2262_v43 = vpop.f32.mrf.mxu0  ;;  %2495 = vmax.xlane.f32.xlu0 %v2494_v48 }
 0x970   :  { %v2188_v49 = vpop.f32.mrf.mxu1  ;;  %v2263_v54 = vadd.f32 %v2262_v43, %v1889_v30 }
 0x971   :  { %v2189_v50 = vadd.f32 %v2188_v49, %v1893_v34  ;;  %v3724_v52 = vpop.f32.mrf.mxu0 }
 0x972   :  { %v3719_v53 = vpop.f32.mrf.mxu1  ;;  %v2500_v63 = vsel %vm296_vm2, %v2263_v54, -inf }
 0x973   :  { %v2497_v55 = vsel %vm296_vm2, %v2189_v50, -inf }
 0x974   :  { %v2410_v56 = vpop.f32.mrf.mxu0  ;;  %2498 = vmax.xlane.f32.xlu0 %v2497_v55  ;;  %v2336_v57 = vpop.f32.mrf.mxu1 }
 0x975   :  { %v4453_v58 = vadd.f32 %v2336_v57, %v1893_v34  ;;  %v2411_v62 = vadd.f32 %v2410_v56, %v1889_v30 }
 0x976   :  { %v3729_v59 = vpop.f32.mrf.mxu1  ;;  %v3734_v61 = vpop.f32.mrf.mxu0 }
 0x977   :  { %v2503_v0 = vsel %vm296_vm2, %v4453_v58, -inf  ;;  %v2506_v3 = vsel %vm296_vm2, %v2411_v62, -inf }
 0x978   :  { %2501 = vmax.xlane.f32.xlu0 %v2500_v63  ;;  %2504 = vmax.xlane.f32.xlu1 %v2503_v0 }
 0x979   :  { %v2484_v1 = vpop.f32.mrf.mxu1 }
 0x97a   :  { %v4465_v5 = vadd.f32 %v2484_v1, %v1893_v34 }
 0x97b   :  { %v3739_v2 = vpop.f32.mrf.mxu1 }
 0x97c   :  { %2507 = vmax.xlane.f32.xlu0 %v2506_v3  ;;  %v2509_v9 = vsel %vm296_vm2, %v4465_v5, -inf }
 0x985   :  { %v2490_v10 = vpop.xlane.xlu0 %2489 }
 0x989   :  { %1874 = vrot.lane.b32.xlu1 %v4387_v8, %s4038_s25  ;;  %v2493_v12 = vpop.xlane.xlu1 %2492 }
 0x98a   :  { %v2513_v39 = vsub.f32 %v4447_v41, %v2493_v12 }
 0x98c   :  { %v2522_v42 = vmul.f32 1.442695, %v2513_v39 }
 0x992   :  { %1872 = vrot.lane.b32.xlu0 %v4380_v4, %s4038_s25 }
 0x996   :  { %1882 = vrot.lane.b32.xlu0 %v4383_v7, %s4041_s0 }
 0x9ad   :  { %2510 = vmax.xlane.f32.xlu1 %v2509_v9 }
 0x9be   :  { %1876 = vrot.lane.b32.xlu1 %v4380_v4, %s4040_s26  ;;  %v2512_v4 = vsub.f32 %v4443_v33, %v2490_v10 }
 0x9c2   :  { %1878 = vrot.lane.b32.xlu1 %v4387_v8, %s4040_s26  ;;  %v2520_v8 = vmul.f32 1.442695, %v2512_v4 }
 0x9c4   :  { %3883 = vpow2.f32 %v2520_v8 }
 0x9c6   :  { %1884 = vrot.lane.b32.xlu1 %v1832_v60, %s4041_s0  ;;  %s4043_s0 = smov [#allocation10]  }
 0x9c7   :  { %s3432_s30 = sshll.u32 %s4043_s0, 4  ;;  %s3433_s30 = int_to_ptr.vmem [resolvable:$true] %s3432_s30 }
 0x9c8   :  { %p4004_p7 = scmp.lt.s32.totalorder %s3433_s30, %s3433_s30 }
 0x9d1   :  { %v3884_v25 = vpop.eup %3883 }
 0x9d2   :  { %v2536_v26 = vsel %vm296_vm2, %v3884_v25, 0.0 }
 0x9f8   :  { %v2496_v11 = vpop.xlane.xlu0 %2495 }
 0x9f9   :  { %v2514_v19 = vsub.f32 %v2115_v46, %v2496_v11 }
 0x9fb   :  { %v2524_v6 = vmul.f32 1.442695, %v2514_v19 }
 0x9fd   :  { %v2499_v13 = vpop.xlane.xlu0 %2498  ;;  %3885 = vpow2.f32 %v2524_v6 }
 0x9fe   :  { %v2515_v20 = vsub.f32 %v2189_v50, %v2499_v13 }
 0xa00   :  { %v2526_v35 = vmul.f32 1.442695, %v2515_v20 }
 0xa01   :  { %v2502_v14 = vpop.xlane.xlu0 %2501  ;;  %v2505_v7 = vpop.xlane.xlu1 %2504 }
 0xa02   :  { %v2516_v21 = vsub.f32 %v2263_v54, %v2502_v14  ;;  %3887 = vpow2.f32 %v2526_v35  ;;  %v2517_v40 = vsub.f32 %v4453_v58, %v2505_v7 }
 0xa04   :  { %v2528_v22 = vmul.f32 1.442695, %v2516_v21  ;;  %v2530_v44 = vmul.f32 1.442695, %v2517_v40 }
 0xa05   :  { %v2508_v15 = vpop.xlane.xlu0 %2507  ;;  %v1875_v16 = vpop.permute.xlu1 %1874 }
 0xa06   :  { %3746 = vmatpush3.msra.mxu1 %v1875_v16  ;;  %2800 = vrot.lane.b32.xlu1 %v1875_v16, %s4038_s25  ;;  %v2518_v23 = vsub.f32 %v2411_v62, %v2508_v15  ;;  %3889 = vpow2.f32 %v2528_v22 }
 0xa07   :  { %3755 = vmatprep.subr.mxu1 %v4033_v18 }
 0xa08   :  { %v2532_v24 = vmul.f32 1.442695, %v2518_v23 }
 0xa09   :  { %v1873_v17 = vpop.permute.xlu0 %1872 }
 0xa0a   :  { %3741 = vmatpush3.msra.mxu0 %v1873_v17  ;;  %2724 = vrot.lane.b32.xlu0 %v1873_v17, %s4038_s25  ;;  %3891 = vpow2.f32 %v2532_v24  ;;  %v3886_v27 = vpop.eup %3885 }
 0xa0b   :  { %3750 = vmatprep.subr.mxu0 %v4033_v18  ;;  %v2542_v28 = vsel %vm296_vm2, %v3886_v27, 0.0  ;;  %3893 = vpow2.f32 %v2522_v42 }
 0xa0c   :  { %3895 = vpow2.f32 %v2530_v44 }
 0xa0d   :  { %v1883_v60 = vpop.permute.xlu0 %1882 }
 0xa0f   :  { %v4481_v29 = vpop.eup %3887 }
 0xa10   :  { %v2545_v38 = vsel %vm296_vm2, %v4481_v29, 0.0 }
 0xa13   :  { %v3890_v30 = vpop.eup %3889 }
 0xa14   :  { %v2548_v31 = vsel %vm296_vm2, %v3890_v30, 0.0 }
 0xa17   :  { %v3892_v32 = vpop.eup %3891 }
 0xa18   :  { %v2554_v34 = vsel %vm296_vm2, %v3892_v32, 0.0  ;;  %v3894_v48 = vpop.eup %3893 }
 0xa19   :  { %v2539_v43 = vsel %vm296_vm2, %v3894_v48, 0.0  ;;  %v4494_v49 = vpop.eup %3895 }
 0xa1a   :  { %v2551_v41 = vsel %vm296_vm2, %v4494_v49, 0.0 }
 0xa29   :  { %2537 = vadd.xlane.f32.xlu0 %v2536_v26 }
 0xa2d   :  { %2543 = vadd.xlane.f32.xlu0 %v2542_v28 }
 0xa31   :  { %2546 = vadd.xlane.f32.xlu0 %v2545_v38 }
 0xa35   :  { %2549 = vadd.xlane.f32.xlu0 %v2548_v31 }
 0xa36   :  { %v2511_v33 = vpop.xlane.xlu1 %2510 }
 0xa37   :  { %v2519_v46 = vsub.f32 %v4465_v5, %v2511_v33 }
 0xa39   :  { %2555 = vadd.xlane.f32.xlu0 %v2554_v34  ;;  %v2534_v47 = vmul.f32 1.442695, %v2519_v46 }
 0xa3a   :  { %v1877_v36 = vpop.permute.xlu1 %1876 }
 0xa3b   :  { %2876 = vrot.lane.b32.xlu1 %v1877_v36, %s4038_s25  ;;  %3897 = vpow2.f32 %v2534_v47 }
 0xa3e   :  { %v1879_v37 = vpop.permute.xlu1 %1878 }
 0xa3f   :  { %2952 = vrot.lane.b32.xlu1 %v1879_v37, %s4038_s25 }
 0xa42   :  { %v1885_v53 = vpop.permute.xlu1 %1884 }
 0xa48   :  { %v4498_v50 = vpop.eup %3897 }
 0xa49   :  { %v2557_v52 = vsel %vm296_vm2, %v4498_v50, 0.0 }
 0xa4f   :  { %3028 = vrot.lane.b32.xlu0 %v1883_v60, %s4038_s25 }
 0xa63   :  { %2540 = vadd.xlane.f32.xlu1 %v2539_v43 }
 0xa67   :  { %2552 = vadd.xlane.f32.xlu1 %v2551_v41 }
 0xa6b   :  { %2558 = vadd.xlane.f32.xlu1 %v2557_v52 }
 0xa78   :  { %v2801_v63 = vpop.permute.xlu1 %2800 }
 0xa7c   :  { %3104 = vrot.lane.b32.xlu1 %v1885_v53, %s4038_s25  ;;  %v2725_v54 = vpop.permute.xlu0 %2724 }
 0xaad   :  { %v2877_v2 = vpop.permute.xlu1 %2876 }
 0xab1   :  { %v2953_v12 = vpop.permute.xlu1 %2952 }
 0xab2   :  { %v2538_v55 = vpop.xlane.xlu0 %2537 }
 0xab3   :  { %3899 = vrcp.f32 %v2538_v55 }
 0xab6   :  { %v2544_v56 = vpop.xlane.xlu0 %2543 }
 0xab7   :  { %3901 = vrcp.f32 %v2544_v56 }
 0xaba   :  { %v2547_v57 = vpop.xlane.xlu0 %2546 }
 0xabe   :  { %v2550_v58 = vpop.xlane.xlu0 %2549 }
 0xabf   :  { %3903 = vrcp.f32 %v2550_v58 }
 0xac0   :  { %v3900_v59 = vpop.eup %3899 }
 0xac1   :  { %v2568_v61 = vmul.f32 %v3900_v59, %v3884_v25  ;;  %v3238_v59 = vld [vmem:[#allocation7 + $0x18] sm:$0xff] }
 0xac2   :  { %v2556_v62 = vpop.xlane.xlu0 %2555 }
 0xac3   :  { %3905 = vrcp.f32 %v2556_v62  ;;  %3743 = vmatmul.mubr.msk.f32.vlgmr.msra.gmra.mxu0 %vm296_vm2, %v2568_v61  ;;  %v3237_v61 = vld [vmem:[#allocation7 + $0x10] sm:$0xff]  ;;  %v3236_v62 = vld [vmem:[#allocation7 + $0x8] sm:$0xff] }
 0xac4   :  { %v3902_v0 = vpop.eup %3901  ;;  %3751 = vmatpush3.msra.mxu0 %v2725_v54  ;;  %3752 = vmatprep.mubr.msk.f32.mxu0 %vm4034_vm1, %v4033_v18 }
 0xac5   :  { %3760 = vmatprep.subr.mxu0 %v4033_v18  ;;  %v2570_v1 = vmul.f32 %v3902_v0, %v3886_v27  ;;  %v3342_v0 = vld [vmem:[%s4621_s7 + $0x78] sm:$0xff] }
 0xac6   :  { %v3029_v9 = vpop.permute.xlu0 %3028 }
 0xac7   :  { %3753 = vmatmul.mubr.msk.f32.vlgmr.msra.gmra.mxu0 %vm296_vm2, %v2570_v1  ;;  %v3341_v1 = vld [vmem:[%s4621_s7 + $0x70] sm:$0xff] }
 0xac8   :  { %3761 = vmatpush3.msra.mxu0 %v2877_v2  ;;  %3762 = vmatprep.mubr.msk.f32.mxu0 %vm4034_vm1, %v4033_v18  ;;  %v3340_v2 = vld [vmem:[%s4621_s7 + $0x68] sm:$0xff] }
 0xac9   :  { %3770 = vmatprep.subr.mxu0 %v4033_v18 }
 0xacc   :  { %v3904_v3 = vpop.eup %3903 }
 0xacd   :  { %v2572_v5 = vmul.f32 %v3904_v3, %v3890_v30  ;;  %v3508_v30 = vld [vmem:[#allocation8 + $0xa] ss:$0 sm:$0xff]  ;;  %v3339_v3 = vld [vmem:[%s4621_s7 + $0x60] sm:$0xff] }
 0xacf   :  { %3763 = vmatmul.mubr.msk.f32.vlgmr.msra.gmra.mxu0 %vm296_vm2, %v2572_v5  ;;  %v3338_v5 = vld [vmem:[%s4621_s7 + $0x58] sm:$0xff] }
 0xad0   :  { %v3906_v10 = vpop.eup %3905  ;;  %3771 = vmatpush3.msra.mxu0 %v3029_v9  ;;  %3772 = vmatprep.mubr.msk.f32.mxu0 %vm4034_vm1, %v4033_v18  ;;  %v3337_v9 = vld [vmem:[%s4621_s7 + $0x50] sm:$0xff] }
 0xad1   :  { %v2574_v11 = vmul.f32 %v3906_v10, %v3892_v32  ;;  %3780 = vmatprep.subr.mxu0 %v3238_v59  ;;  %v3336_v10 = vld [vmem:[%s4621_s7 + $0x48] sm:$0xff] }
 0xad3   :  { %3773 = vmatmul.mubr.msk.f32.vlgmr.msra.gmra.mxu0 %vm296_vm2, %v2574_v11  ;;  %v3335_v11 = vld [vmem:[%s4621_s7 + $0x40] sm:$0xff] }
 0xad4   :  { %3781 = vmatpush3.msra.mxu0 %v3238_v59 }
 0xad5   :  { %3782 = vmatprep.subr.mxu0 %v3237_v61 }
 0xad6   :  { %3783 = vmatpush3.msra.mxu0 %v3237_v61 }
 0xad7   :  { %3784 = vmatprep.subr.mxu0 %v3236_v62 }
 0xad8   :  { %3785 = vmatpush3.msra.mxu0 %v3236_v62 }
 0xaec   :  { %v2541_v13 = vpop.xlane.xlu1 %2540 }
 0xaed   :  { %3907 = vrcp.f32 %v2541_v13  ;;  %v3333_v13 = vld [vmem:[%s4621_s7 + $0x30] sm:$0xff] }
 0xaee   :  { %3909 = vrcp.f32 %v2547_v57 }
 0xaf0   :  { %v2553_v14 = vpop.xlane.xlu1 %2552 }
 0xaf1   :  { %3911 = vrcp.f32 %v2553_v14  ;;  %v3332_v14 = vld [vmem:[%s4621_s7 + $0x28] sm:$0xff] }
 0xaf4   :  { %v2559_v7 = vpop.xlane.xlu1 %2558 }
 0xaf5   :  { %3913 = vrcp.f32 %v2559_v7  ;;  %v3331_v7 = vld [vmem:[%s4621_s7 + $0x20] sm:$0xff] }
 0xaf8   :  { %v3105_v20 = vpop.permute.xlu1 %3104 }
 0xafa   :  { %v3908_v15 = vpop.eup %3907 }
 0xafb   :  { %v2569_v16 = vmul.f32 %v3908_v15, %v3894_v48  ;;  %v3910_v17 = vpop.eup %3909 }
 0xafc   :  { %v2571_v4 = vmul.f32 %v3910_v17, %v4481_v29 }
 0xafd   :  { %3748 = vmatmul.mubr.msk.f32.vlgmr.msra.gmra.mxu1 %vm296_vm2, %v2569_v16 }
 0xafe   :  { %3756 = vmatpush3.msra.mxu1 %v2801_v63  ;;  %3757 = vmatprep.mubr.msk.f32.mxu1 %vm4034_vm1, %v4033_v18  ;;  %v3912_v8 = vpop.eup %3911  ;;  %v3235_v63 = vld [vmem:[#allocation7] sm:$0xff] }
 0xaff   :  { %3765 = vmatprep.subr.mxu1 %v4033_v18  ;;  %v2573_v19 = vmul.f32 %v3912_v8, %v4494_v49  ;;  %3786 = vmatprep.subr.mxu0 %v3235_v63  ;;  %v3509_v8 = vld [vmem:[#allocation8 + $0x4] ss:$0 sm:$0xff] }
 0xb00   :  { %3787 = vmatpush3.msra.mxu0 %v3235_v63 }
 0xb01   :  { %3758 = vmatmul.mubr.msk.f32.vlgmr.msra.gmra.mxu1 %vm296_vm2, %v2571_v4 }
 0xb02   :  { %3766 = vmatpush3.msra.mxu1 %v2953_v12  ;;  %3767 = vmatprep.mubr.msk.f32.mxu1 %vm4034_vm1, %v4033_v18  ;;  %v3914_v6 = vpop.eup %3913  ;;  %v3334_v12 = vld [vmem:[%s4621_s7 + $0x38] sm:$0xff] }
 0xb03   :  { %3775 = vmatprep.subr.mxu1 %v4033_v18  ;;  %v2575_v35 = vmul.f32 %v3914_v6, %v4498_v50  ;;  %v3510_v6 = vld [vmem:[#allocation8 + $0x5] ss:$0 sm:$0xff] }
 0xb05   :  { %3768 = vmatmul.mubr.msk.f32.vlgmr.msra.gmra.mxu1 %vm296_vm2, %v2573_v19 }
 0xb06   :  { %3776 = vmatpush3.msra.mxu1 %v3105_v20  ;;  %3777 = vmatprep.mubr.msk.f32.mxu1 %vm4034_vm1, %v4033_v18 }
 0xb07   :  { %3791 = vmatprep.subr.mxu1 %v3342_v0 }
 0xb09   :  { %3778 = vmatmul.mubr.msk.f32.vlgmr.msra.gmra.mxu1 %vm296_vm2, %v2575_v35 }
 0xb0a   :  { %3792 = vmatpush3.msra.mxu1 %v3342_v0 }
 0xb0b   :  { %3793 = vmatprep.subr.mxu1 %v3341_v1 }
 0xb0c   :  { %3794 = vmatpush3.msra.mxu1 %v3341_v1 }
 0xb0d   :  { %3795 = vmatprep.subr.mxu1 %v3340_v2 }
 0xb0e   :  { %3796 = vmatpush3.msra.mxu1 %v3340_v2 }
 0xb0f   :  { %3797 = vmatprep.subr.mxu1 %v3339_v3 }
 0xb10   :  { %3798 = vmatpush3.msra.mxu1 %v3339_v3 }
 0xb11   :  { %3799 = vmatprep.subr.mxu1 %v3338_v5 }
 0xb12   :  { %3800 = vmatpush3.msra.mxu1 %v3338_v5 }
 0xb13   :  { %3801 = vmatprep.subr.mxu1 %v3337_v9 }
 0xb14   :  { %3802 = vmatpush3.msra.mxu1 %v3337_v9 }
 0xb15   :  { %3803 = vmatprep.subr.mxu1 %v3336_v10 }
 0xb16   :  { %3804 = vmatpush3.msra.mxu1 %v3336_v10 }
 0xb17   :  { %3805 = vmatprep.subr.mxu1 %v3335_v11 }
 0xb18   :  { %3806 = vmatpush3.msra.mxu1 %v3335_v11 }
 0xb19   :  { %3807 = vmatprep.subr.mxu1 %v3334_v12 }
 0xb1a   :  { %3808 = vmatpush3.msra.mxu1 %v3334_v12 }
 0xb1b   :  { %3809 = vmatprep.subr.mxu1 %v3333_v13 }
 0xb1c   :  { %3810 = vmatpush3.msra.mxu1 %v3333_v13 }
 0xb1d   :  { %3811 = vmatprep.subr.mxu1 %v3332_v14 }
 0xb1e   :  { %3812 = vmatpush3.msra.mxu1 %v3332_v14 }
 0xb1f   :  { %3813 = vmatprep.subr.mxu1 %v3331_v7 }
 0xb20   :  { %3814 = vmatpush3.msra.mxu1 %v3331_v7 }
 0xb83   :  { %v2646_v21 = vpop.f32.mrf.mxu0 }
 0xb85   :  { %v3744_v22 = vpop.f32.mrf.mxu0 }
 0xb87   :  { %v2796_v23 = vpop.f32.mrf.mxu0 }
 0xb88   :  { %v3180_v26 = vadd.f32 %v2796_v23, %v2646_v21 }
 0xb89   :  { %v3754_v24 = vpop.f32.mrf.mxu0 }
 0xb8f   :  { %v2948_v25 = vpop.f32.mrf.mxu0 }
 0xb90   :  { %v3182_v28 = vadd.f32 %v3180_v26, %v2948_v25 }
 0xb91   :  { %v3764_v27 = vpop.f32.mrf.mxu0 }
 0xb93   :  { %v3100_v29 = vpop.f32.mrf.mxu0 }
 0xb94   :  { %v3184_v38 = vadd.f32 %v3182_v28, %v3100_v29  ;;  %v3330_v28 = vld [vmem:[%s4621_s7 + $0x18] sm:$0xff]  ;;  %v3329_v29 = vld [vmem:[%s4621_s7 + $0x10] sm:$0xff] }
 0xb95   :  { %v3774_v31 = vpop.f32.mrf.mxu0  ;;  %3815 = vmatprep.subr.mxu1 %v3330_v28 }
 0xb96   :  { %v3186_v32 = vadd.f32 %v3184_v38, %v4341_v45  ;;  %3816 = vmatpush3.msra.mxu1 %v3330_v28  ;;  %v3328_v38 = vld [vmem:[%s4621_s7 + $0x8] sm:$0xff] }
 0xb97   :  { %3817 = vmatprep.subr.mxu1 %v3329_v29  ;;  %v3511_v31 = vld [vmem:[#allocation8 + $0xb] ss:$0 sm:$0xff] }
 0xb98   :  { %v4531_v33 = vadd.f32 %v3508_v30, %v3186_v32  ;;  %3818 = vmatpush3.msra.mxu1 %v3329_v29 }
 0xb99   :  { %3819 = vmatprep.subr.mxu1 %v3328_v38 }
 0xb9a   :  { %v3197_v18 = vsel %vm126_vm0, %v4531_v33, 0.0  ;;  %3820 = vmatpush3.msra.mxu1 %v3328_v38 }
 0xb9b   :  { %3198 = vadd.xlane.f32.xlu0 %v3197_v18 }
 0xbbd   :  { %v2720_v34 = vpop.f32.mrf.mxu1 }
 0xbbf   :  { %v3749_v36 = vpop.f32.mrf.mxu1 }
 0xbc1   :  { %v2872_v37 = vpop.f32.mrf.mxu1 }
 0xbc2   :  { %v3181_v40 = vadd.f32 %v2872_v37, %v2720_v34 }
 0xbc3   :  { %v3759_v39 = vpop.f32.mrf.mxu1 }
 0xbc5   :  { %v3024_v42 = vpop.f32.mrf.mxu1 }
 0xbc6   :  { %v3183_v44 = vadd.f32 %v3181_v40, %v3024_v42  ;;  %v3514_v42 = vld [vmem:[#allocation8 + $0xc] ss:$0 sm:$0xff] }
 0xbc7   :  { %v3769_v60 = vpop.f32.mrf.mxu1 }
 0xbc9   :  { %v3176_v46 = vpop.f32.mrf.mxu1 }
 0xbca   :  { %v3185_v47 = vadd.f32 %v3183_v44, %v3176_v46 }
 0xbcb   :  { %v3779_v48 = vpop.f32.mrf.mxu1 }
 0xbcc   :  { %v3187_v43 = vadd.f32 %v3185_v47, %v4345_v51 }
 0xbce   :  { %v4536_v45 = vadd.f32 %v3508_v30, %v3187_v43  ;;  %v3327_v30 = vld [vmem:[%s4621_s7] sm:$0xff]  ;;  %s3999_s7 = scalar_lea.vmem %s3433_s30, 256 }
 0xbcf   :  { %3821 = vmatprep.subr.mxu1 %v3327_v30  ;;  %p4000_p6 = scmp.ne.s32.totalorder %s3433_s30, %s3999_s7  ;;  %p4005_p8 = scmp.lt.s32.totalorder %s3999_s7, %s3999_s7 }
 0xbd0   :  { %v3200_v49 = vsel %vm126_vm0, %v4536_v45, 0.0  ;;  %3822 = vmatpush3.msra.mxu1 %v3327_v30 }
 0xbd1   :  { %3201 = vadd.xlane.f32.xlu1 %v3200_v49  ;;  %p4006_p9 = por %p4005_p8, %p4004_p7 }
 0xbd3   :  { %p4007_p10 = pnand %p4006_p9, %p4000_p6 }
 0xc24   :  { %v3199_v41 = vpop.xlane.xlu0 %3198 }
 0xc25   :  { %v3203_v50 = vmul.f32 0.03125, %v3199_v41 }
 0xc27   :  { %v4541_v52 = vsub.f32 %v4531_v33, %v3203_v50 }
 0xc29   :  { %v3207_v53 = vmul.f32 %v4541_v52, %v4541_v52 }
 0xc2b   :  { %v3209_v54 = vsel %vm126_vm0, %v3207_v53, 0.0 }
 0xc2c   :  { %3210 = vadd.xlane.f32.xlu0 %v3209_v54 }
 0xc5a   :  { %v3202_v55 = vpop.xlane.xlu1 %3201 }
 0xc5b   :  { %v3204_v56 = vmul.f32 0.03125, %v3202_v55 }
 0xc5d   :  { %v4547_v51 = vsub.f32 %v4536_v45, %v3204_v56 }
 0xc5f   :  { %v3208_v57 = vmul.f32 %v4547_v51, %v4547_v51 }
 0xc61   :  { %v3212_v58 = vsel %vm126_vm0, %v3208_v57, 0.0 }
 0xc62   :  { %3213 = vadd.xlane.f32.xlu0 %v3212_v58 }
 0xcb5   :  { %v3211_v15 = vpop.xlane.xlu0 %3210 }
 0xcb6   :  { %v3215_v16 = vmul.f32 0.03125, %v3211_v15 }
 0xcb8   :  { %v3217_v17 = vadd.f32 1e-05, %v3215_v16 }
 0xcba   :  { %3915 = vrsqrt.f32 %v3217_v17 }
 0xcc7   :  { %v3916_v4 = vpop.eup %3915 }
 0xcc8   :  { %v3221_v19 = vmul.f32 %v3916_v4, %v4541_v52 }
 0xcca   :  { %v3227_v20 = vmul.f32 %v3509_v8, %v3221_v19 }
 0xccc   :  { %v3233_v35 = vadd.f32 %v3510_v6, %v3227_v20 }
 0xcce   :  { %3788 = vmatprep.mubr.msk.f32.mxu0 %vm126_vm0, %v3233_v35 }
 0xceb   :  { %v3214_v21 = vpop.xlane.xlu0 %3213 }
 0xcec   :  { %v3216_v22 = vmul.f32 0.03125, %v3214_v21 }
 0xcee   :  { %v3218_v23 = vadd.f32 1e-05, %v3216_v22 }
 0xcf0   :  { %3917 = vrsqrt.f32 %v3218_v23 }
 0xcfd   :  { %v3918_v24 = vpop.eup %3917 }
 0xcfe   :  { %v3222_v25 = vmul.f32 %v3918_v24, %v4547_v51 }
 0xd00   :  { %v3228_v26 = vmul.f32 %v3509_v8, %v3222_v25 }
 0xd02   :  { %v3234_v27 = vadd.f32 %v3510_v6, %v3228_v26 }
 0xd04   :  { %3789 = vmatmul.mubr.msk.f32.vlgmr.msra.gmra.mxu0 %vm126_vm0, %v3234_v27 }
 0xdc4   :  { %v3790_v32 = vpop.f32.mrf.mxu0 }
 0xdc5   :  { %v3322_v18 = vadd.f32 %v3790_v32, %v3511_v31 }
 0xdc6   :  { %v3316_v34 = vpop.f32.mrf.mxu0 }
 0xdc7   :  { %v3317_v36 = vadd.f32 %v3511_v31, %v3316_v34  ;;  %v3326_v39 = vmax.f32 %v3322_v18, 0.0 }
 0xdc9   :  { %v3325_v37 = vmax.f32 %v3317_v36, 0.0 }
 0xdcb   :  { %3823 = vmatprep.mubr.f32.mxu1 %v3325_v37 }
 0xdcc   :  { %3824 = vmatmul.mubr.f32.vlgmr.msra.gmra.mxu1 %v3326_v39 }
 0xe8c   :  { %v3825_v40 = vpop.f32.mrf.mxu1 }
 0xe8d   :  { %v3420_v60 = vadd.f32 %v3825_v40, %v3514_v42 }
 0xe8e   :  { %v3414_v44 = vpop.f32.mrf.mxu1 }
 0xe8f   :  { %v3424_v46 = vadd.f32 %v3420_v60, %v4536_v45  ;;  %v3415_v47 = vadd.f32 %v3514_v42, %v3414_v44 }
 0xe91   :  { %3426 = vst.msk [vmem:[#allocation10 + $0x8] sm:$0xff] %vm126_vm0, %v3424_v46  ;;  %v3423_v48 = vadd.f32 %v3415_v47, %v4531_v33 }
 0xe93   :  { %3425 = vst.msk [vmem:[#allocation10] sm:$0xff] %vm126_vm0, %v3423_v48 }
 0xe94   :  { %4010 = shalt.err (!%p4007_p10)
}
 0xe95   :  { %3438 = dma.vmem_to_hbm [thread:$0]  %s3433_s30, 256, %s4623_s9, [#allocation4], %s4029_s14, %s4029_s14, %s4030_s15  }
 0xe96   :  { %4025 = dma.done.wait [#allocation4], 256  }
 0xe97   :  { %4026 = vsyncadd [#allocation4], 4294967040 }
 0xe98   :  { %3442 = vsyncpa [#allocation3], 1 }
 0xe99   :  { %3443 = vsyncpa [#allocation6], 1 }
 0xe9a   :  { %3444 = vsyncpa [#allocation9], 1 }
 0xe9b   :  { %3445 = vsyncpa [#allocation4], 1 }

</bundles_post_ra>
